<compile_context>
chip_gen: v6e
topology: v6e:2x2x1
jax: 0.10.0
libtpu: 0.0.40
codegen_flags: <defaults>
</compile_context>

<pallas_src>
import functools
import math

import jax
import jax.numpy as jnp
from jax.experimental import pallas as pl
from jax.experimental.pallas import tpu as pltpu

# ----------------------- small BERT config -----------------------
VOCAB = 128          # (module default is 21000; shrunk for a synthetic run)
HIDDEN = 32
N_LAYERS = 2
N_HEADS = 4
HEAD_DIM = HIDDEN // N_HEADS
INTERMEDIATE = 64
MAX_POS = 16
TYPE_VOCAB = 2
NUM_LABELS = 4
LN_EPS = 1e-12

# Flip to jnp.bfloat16 on v5e/v6e/v7x for higher MXU throughput and halved
# VMEM/HBM weight traffic (accumulation stays f32 via preferred_element_type).
# Kept f32 here for exact parity with the f32 reference at toy sizes.  If
# flipped, clamp the additive attention mask to the score dtype's min.
MATMUL_DTYPE = jnp.float32


# ----------------------- in-kernel helpers -----------------------
def _mm(a, b):
    """MXU matmul with f32 accumulation (optionally bf16 operands)."""
    return jnp.dot(a.astype(MATMUL_DTYPE), b.astype(MATMUL_DTYPE),
                   preferred_element_type=jnp.float32)


def _ln(v, g, b, eps):
    mu = jnp.mean(v, axis=-1, keepdims=True)
    var = jnp.mean((v - mu) ** 2, axis=-1, keepdims=True)
    return (v - mu) * jax.lax.rsqrt(var + eps) * g + b


# ----------------------- the single fused kernel -----------------------
def _bert_kernel(emb_ref, mask_ref, eg_ref, eb_ref,
                 wqkv_ref, bqkv_ref, wo_ref, bo_ref, l1g_ref, l1b_ref,
                 wi_ref, bi_ref, wo2_ref, bo2_ref, l2g_ref, l2b_ref,
                 pw_ref, pb_ref, cw_ref, cb_ref, *rest,
                 batch, seq, n_heads, head_dim, eps, with_loss):
    """grid axis 0 = encoder layer.  Activation stays resident in x_scratch."""
    if with_loss:
        lab_ref, logits_ref, loss_ref, x_scratch = rest
    else:
        logits_ref, x_scratch = rest

    l = pl.program_id(0)
    n_layers = pl.num_programs(0)
    hidden = n_heads * head_dim
    scale = 1.0 / math.sqrt(head_dim)

    # ---- step 0: embedding LayerNorm (+ defensive output init) ----
    @pl.when(l == 0)
    def _():
        x_scratch[...] = _ln(emb_ref[...].astype(jnp.float32),
                             eg_ref[...], eb_ref[...], eps)
        logits_ref[...] = jnp.zeros_like(logits_ref)
        if with_loss:
            loss_ref[...] = jnp.zeros_like(loss_ref)

    x = x_scratch[...]                                        # [B*S, H]

    # ---- fused QKV projection: a single matmul with N = 3H ----
    qkv = _mm(x, wqkv_ref[0]) + bqkv_ref[0]                   # [B*S, 3H]
    wo = wo_ref[0]                                            # [H, H]

    # ---- scaled-dot-product attention with Wo folded per head.  Per-head
    #      [S, Dh] tensors never leave VMEM/vregs; no Dh-on-lane relayout.
    #      Static unroll is fine at B*n_heads = 8.
    # TODO(synk): for real configs (12+ heads) use lax.fori_loop over heads
    # with pl.ds/pl.multiple_of column slices to bound vreg live ranges.
    attn_rows = []
    for b in range(batch):                                    # static unroll
        r0 = b * seq
        # hoisted: one mask broadcast per batch, not per head
        m_full = jnp.broadcast_to(mask_ref[b:b + 1, :], (seq, seq))
        acc = jnp.zeros((seq, hidden), jnp.float32)
        for h in range(n_heads):                              # static unroll
            c0 = h * head_dim
            qh = qkv[r0:r0 + seq, c0:c0 + head_dim]                       # [S, Dh]
            kh = qkv[r0:r0 + seq, hidden + c0:hidden + c0 + head_dim]     # [S, Dh]
            vh = qkv[r0:r0 + seq, 2 * hidden + c0:2 * hidden + c0 + head_dim]
            s = jax.lax.dot_general(
                qh, kh, (((1,), (1,)), ((), ())),
                preferred_element_type=jnp.float32) * scale   # [S, S]
            s = s + m_full                                    # additive mask
            s = s - jnp.max(s, axis=-1, keepdims=True)
            p = jnp.exp(s)
            p = p * pl.reciprocal(jnp.sum(p, axis=-1, keepdims=True),
                                  approx=True)                # EUP, off VALU path
            # Wo fold: V_h @ Wo_h first -> second matmul is lane-dense (N = H)
            vwo_h = _mm(vh, wo[c0:c0 + head_dim, :])          # [S, H]
            acc = acc + _mm(p, vwo_h)                         # [S, H]
        attn_rows.append(acc)
    attn_out = jnp.concatenate(attn_rows, axis=0) + bo_ref[0]  # [B*S, H]

    # ---- residual + LayerNorm 1 ----
    x1 = _ln(x + attn_out, l1g_ref[0], l1b_ref[0], eps)

    # ---- feed-forward + residual + LayerNorm 2 (fused) ----
    h_mid = _mm(x1, wi_ref[0]) + bi_ref[0]
    # TODO(synk): HF BERT default is the exact erf GELU; tanh approximation used here.
    h_mid = jax.nn.gelu(h_mid, approximate=True)
    ff = _mm(h_mid, wo2_ref[0]) + bo2_ref[0]
    x_new = _ln(x1 + ff, l2g_ref[0], l2b_ref[0], eps)
    x_scratch[...] = x_new

    # ---- last step: pooler (tanh) + classifier + optional BCE loss ----
    @pl.when(l == n_layers - 1)
    def _():
        cls_tok = jnp.concatenate(
            [x_new[b * seq:b * seq + 1, :] for b in range(batch)], axis=0)  # [B, H]
        pooled = jnp.tanh(_mm(cls_tok, pw_ref[...]) + pb_ref[...])
        logits = _mm(pooled, cw_ref[...]) + cb_ref[...]                     # [B, L]
        logits_ref[...] = logits.astype(logits_ref.dtype)
        if with_loss:
            z = logits
            y = lab_ref[...]
            # numerically-stable BCEWithLogitsLoss, mean reduction (PyTorch default)
            per = jnp.maximum(z, 0.0) - z * y + jnp.log1p(jnp.exp(-jnp.abs(z)))
            loss_ref[...] = jnp.mean(per, keepdims=True)


def _const_spec(shape):
    zeros = (0,) * len(shape)
    return pl.BlockSpec(shape, lambda l: zeros)


def _layer_spec(shape):
    zeros = (0,) * len(shape)
    return pl.BlockSpec((1,) + shape, lambda l: (l,) + zeros)


# ----------------------- parameter init (deterministic) -----------------------
def init_params(key):
    def normal(k, shape):
        return 0.02 * jax.random.normal(k, shape, dtype=jnp.float32)

    keys = iter(jax.random.split(key, 8 + 8 * N_LAYERS))
    p = {
        "word_emb": normal(next(keys), (VOCAB, HIDDEN)),
        "pos_emb": normal(next(keys), (MAX_POS, HIDDEN)),
        "type_emb": normal(next(keys), (TYPE_VOCAB, HIDDEN)),
        "emb_ln_g": jnp.ones((HIDDEN,), jnp.float32),
        "emb_ln_b": jnp.zeros((HIDDEN,), jnp.float32),
        "pool_w": normal(next(keys), (HIDDEN, HIDDEN)),
        "pool_b": jnp.zeros((HIDDEN,), jnp.float32),
        "cls_w": normal(next(keys), (HIDDEN, NUM_LABELS)),
        "cls_b": jnp.zeros((NUM_LABELS,), jnp.float32),
    }
    wqkv, wo, wi, wo2 = [], [], [], []
    for _ in range(N_LAYERS):
        wq = normal(next(keys), (HIDDEN, HIDDEN))
        wk = normal(next(keys), (HIDDEN, HIDDEN))
        wv = normal(next(keys), (HIDDEN, HIDDEN))
        wqkv.append(jnp.concatenate([wq, wk, wv], axis=1))   # fused QKV weight
        wo.append(normal(next(keys), (HIDDEN, HIDDEN)))
        wi.append(normal(next(keys), (HIDDEN, INTERMEDIATE)))
        wo2.append(normal(next(keys), (INTERMEDIATE, HIDDEN)))
    L = N_LAYERS
    p.update({
        # per-layer weights stacked along a leading layer axis for the grid
        "wqkv": jnp.stack(wqkv),                              # [L, H, 3H]
        "bqkv": jnp.zeros((L, 1, 3 * HIDDEN), jnp.float32),
        "wo":   jnp.stack(wo),                                # [L, H, H]
        "bo":   jnp.zeros((L, 1, HIDDEN), jnp.float32),
        "ln1_g": jnp.ones((L, 1, HIDDEN), jnp.float32),
        "ln1_b": jnp.zeros((L, 1, HIDDEN), jnp.float32),
        "wi":   jnp.stack(wi),                                # [L, H, I]
        "bi":   jnp.zeros((L, 1, INTERMEDIATE), jnp.float32),
        "wo2":  jnp.stack(wo2),                               # [L, I, H]
        "bo2":  jnp.zeros((L, 1, HIDDEN), jnp.float32),
        "ln2_g": jnp.ones((L, 1, HIDDEN), jnp.float32),
        "ln2_b": jnp.zeros((L, 1, HIDDEN), jnp.float32),
    })
    return p


# ----------------------- forward pass -----------------------
def bert_oracle_theme_forward(params, input_ids, attention_mask, labels=None):
    """Mirrors BertForSequenceClassification(problem_type='multi_label_classification').
    Returns (loss, logits); loss is None if labels is None.
    All dropout layers are eval-mode identities."""
    B, S = input_ids.shape
    H, I, L = HIDDEN, INTERMEDIATE, NUM_LABELS

    # --- embeddings (gather + pos/type add stay in JAX) ---
    # TODO(synk): for the real VOCAB=21000 config, move the gather into the
    # Pallas kernel via scalar-prefetched ids + pl.Element row gather.
    we = jnp.take(params["word_emb"], input_ids, axis=0)        # [B, S, H]
    pe = params["pos_emb"][:S]                                  # [S, H]
    te = params["type_emb"][0]                                  # [H] (token_type_ids = 0)
    emb = (we + pe[None, :, :] + te[None, None, :]).reshape(B * S, H)

    # HF-style additive attention mask, [B, S] (kept f32; scores are f32)
    add_mask = (1.0 - attention_mask.astype(jnp.float32)) * jnp.finfo(jnp.float32).min

    with_loss = labels is not None
    kernel = functools.partial(
        _bert_kernel, batch=B, seq=S, n_heads=N_HEADS, head_dim=HEAD_DIM,
        eps=LN_EPS, with_loss=with_loss)

    in_specs = [
        _const_spec((B * S, H)),                        # pre-LN embeddings
        _const_spec((B, S)),                            # additive mask
        _const_spec((1, H)), _const_spec((1, H)),       # emb LN gamma / beta
        _layer_spec((H, 3 * H)), _layer_spec((1, 3 * H)),   # Wqkv, bqkv
        _layer_spec((H, H)), _layer_spec((1, H)),           # Wo, bo
        _layer_spec((1, H)), _layer_spec((1, H)),           # ln1 gamma / beta
        _layer_spec((H, I)), _layer_spec((1, I)),           # Wi, bi
        _layer_spec((I, H)), _layer_spec((1, H)),           # Wo2, bo2
        _layer_spec((1, H)), _layer_spec((1, H)),           # ln2 gamma / beta
        _const_spec((H, H)), _const_spec((1, H)),       # pooler
        _const_spec((H, L)), _const_spec((1, L)),       # classifier
    ]
    args = [
        emb, add_mask,
        params["emb_ln_g"].reshape(1, H), params["emb_ln_b"].reshape(1, H),
        params["wqkv"], params["bqkv"], params["wo"], params["bo"],
        params["ln1_g"], params["ln1_b"],
        params["wi"], params["bi"], params["wo2"], params["bo2"],
        params["ln2_g"], params["ln2_b"],
        params["pool_w"], params["pool_b"].reshape(1, H),
        params["cls_w"], params["cls_b"].reshape(1, L),
    ]

    if with_loss:
        in_specs.append(_const_spec((B, L)))
        args.append(labels.astype(jnp.float32))
        out_shape = (jax.ShapeDtypeStruct((B, L), jnp.float32),
                     jax.ShapeDtypeStruct((1, 1), jnp.float32))
        out_specs = (_const_spec((B, L)), _const_spec((1, 1)))
    else:
        out_shape = jax.ShapeDtypeStruct((B, L), jnp.float32)
        out_specs = _const_spec((B, L))

    result = pl.pallas_call(
        kernel,
        grid=(N_LAYERS,),                               # layer axis: sequential carry
        out_shape=out_shape,
        in_specs=in_specs,
        out_specs=out_specs,
        scratch_shapes=[pltpu.VMEM((B * S, H), jnp.float32)],  # resident activation
        compiler_params=pltpu.CompilerParams(
            dimension_semantics=("arbitrary",),
            # plenty for toy shapes; raise (and use bf16 weights / FFN tiling)
            # for real BERT shapes, especially on v7x's 64 MiB VMEM.
            vmem_limit_bytes=32 * 1024 * 1024),
    )(*args)

    if with_loss:
        logits, loss = result
        return loss[0, 0], logits
    return None, result


# ----------------------- demo / smoke test -----------------------
if __name__ == "__main__":
    key = jax.random.PRNGKey(0)
    k_param, k_ids, k_lab = jax.random.split(key, 3)

    params = init_params(k_param)

    B, S = 2, 8
    input_ids = jax.random.randint(k_ids, (B, S), 0, VOCAB, dtype=jnp.int32)
    attention_mask = jnp.array(
        [[1, 1, 1, 1, 1, 1, 1, 1],
         [1, 1, 1, 1, 1, 0, 0, 0]], dtype=jnp.int32)
    labels = jax.random.bernoulli(k_lab, 0.5, (B, NUM_LABELS)).astype(jnp.float32)

    loss, logits = bert_oracle_theme_forward(params, input_ids, attention_mask, labels)
    jax.block_until_ready(loss)
    jax.block_until_ready(logits)

    assert logits.shape == (B, NUM_LABELS)
    assert loss.shape == ()
    assert bool(jnp.isfinite(loss)) and bool(jnp.all(jnp.isfinite(logits)))

    # also exercise the labels=None path (logits only)
    loss_none, logits2 = bert_oracle_theme_forward(params, input_ids, attention_mask, None)
    jax.block_until_ready(logits2)
    assert loss_none is None and logits2.shape == (B, NUM_LABELS)

    print("KERNEL_OK")
</pallas_src>

<mosaic_0001>
module attributes {stable_mosaic.version = 11 : i64} {
  func.func @_bert_kernel(%arg0: i32, %arg1: memref<16x32xf32, #tpu.memory_space<vmem>>, %arg2: memref<2x8xf32, #tpu.memory_space<vmem>>, %arg3: memref<1x32xf32, #tpu.memory_space<vmem>>, %arg4: memref<1x32xf32, #tpu.memory_space<vmem>>, %arg5: memref<1x32x96xf32, #tpu.memory_space<vmem>>, %arg6: memref<1x1x96xf32, #tpu.memory_space<vmem>>, %arg7: memref<1x32x32xf32, #tpu.memory_space<vmem>>, %arg8: memref<1x1x32xf32, #tpu.memory_space<vmem>>, %arg9: memref<1x1x32xf32, #tpu.memory_space<vmem>>, %arg10: memref<1x1x32xf32, #tpu.memory_space<vmem>>, %arg11: memref<1x32x64xf32, #tpu.memory_space<vmem>>, %arg12: memref<1x1x64xf32, #tpu.memory_space<vmem>>, %arg13: memref<1x64x32xf32, #tpu.memory_space<vmem>>, %arg14: memref<1x1x32xf32, #tpu.memory_space<vmem>>, %arg15: memref<1x1x32xf32, #tpu.memory_space<vmem>>, %arg16: memref<1x1x32xf32, #tpu.memory_space<vmem>>, %arg17: memref<32x32xf32, #tpu.memory_space<vmem>>, %arg18: memref<1x32xf32, #tpu.memory_space<vmem>>, %arg19: memref<32x4xf32, #tpu.memory_space<vmem>>, %arg20: memref<1x4xf32, #tpu.memory_space<vmem>>, %arg21: memref<2x4xf32, #tpu.memory_space<vmem>>, %arg22: memref<2x4xf32, #tpu.memory_space<vmem>>, %arg23: memref<1x1xf32, #tpu.memory_space<vmem>>, %arg24: memref<16x32xf32, #tpu.memory_space<vmem>>) attributes {dimension_semantics = [#tpu.dimension_semantics<arbitrary>], iteration_bounds = array<i64: 2>, scalar_prefetch = 0 : i64, scratch_operands = 1 : i64, tpu.core_type = #tpu.core_type<tc>, window_params = [{pipeline_mode = #tpu.pipeline_mode<synchronous>, transform_indices = @transform_0, window_bounds = array<i64: 16, 32>}, {pipeline_mode = #tpu.pipeline_mode<synchronous>, transform_indices = @transform_1, window_bounds = array<i64: 2, 8>}, {pipeline_mode = #tpu.pipeline_mode<synchronous>, transform_indices = @transform_2, window_bounds = array<i64: 1, 32>}, {pipeline_mode = #tpu.pipeline_mode<synchronous>, transform_indices = @transform_3, window_bounds = array<i64: 1, 32>}, {transform_indices = @transform_4, window_bounds = array<i64: 1, 32, 96>}, {transform_indices = @transform_5, window_bounds = array<i64: 1, 1, 96>}, {transform_indices = @transform_6, window_bounds = array<i64: 1, 32, 32>}, {transform_indices = @transform_7, window_bounds = array<i64: 1, 1, 32>}, {transform_indices = @transform_8, window_bounds = array<i64: 1, 1, 32>}, {transform_indices = @transform_9, window_bounds = array<i64: 1, 1, 32>}, {transform_indices = @transform_10, window_bounds = array<i64: 1, 32, 64>}, {transform_indices = @transform_11, window_bounds = array<i64: 1, 1, 64>}, {transform_indices = @transform_12, window_bounds = array<i64: 1, 64, 32>}, {transform_indices = @transform_13, window_bounds = array<i64: 1, 1, 32>}, {transform_indices = @transform_14, window_bounds = array<i64: 1, 1, 32>}, {transform_indices = @transform_15, window_bounds = array<i64: 1, 1, 32>}, {pipeline_mode = #tpu.pipeline_mode<synchronous>, transform_indices = @transform_16, window_bounds = array<i64: 32, 32>}, {pipeline_mode = #tpu.pipeline_mode<synchronous>, transform_indices = @transform_17, window_bounds = array<i64: 1, 32>}, {pipeline_mode = #tpu.pipeline_mode<synchronous>, transform_indices = @transform_18, window_bounds = array<i64: 32, 4>}, {pipeline_mode = #tpu.pipeline_mode<synchronous>, transform_indices = @transform_19, window_bounds = array<i64: 1, 4>}, {pipeline_mode = #tpu.pipeline_mode<synchronous>, transform_indices = @transform_20, window_bounds = array<i64: 2, 4>}, {pipeline_mode = #tpu.pipeline_mode<synchronous>, transform_indices = @transform_21, window_bounds = array<i64: 2, 4>}, {pipeline_mode = #tpu.pipeline_mode<synchronous>, transform_indices = @transform_22, window_bounds = array<i64: 1, 1>}]} {
    %c0_i32 = arith.constant 0 : i32
    %0 = arith.cmpi eq, %arg0, %c0_i32 : i32
    %1 = arith.extui %0 : i1 to i32
    %c0_i32_0 = arith.constant 0 : i32
    %2 = arith.cmpi ne, %1, %c0_i32_0 : i32
    scf.if %2 {
      %c0_110 = arith.constant 0 : index
      %c0_111 = arith.constant 0 : index
      %279 = vector.load %arg1[%c0_110, %c0_111] : memref<16x32xf32, #tpu.memory_space<vmem>>, vector<16x32xf32>
      %c0_112 = arith.constant 0 : index
      %c0_113 = arith.constant 0 : index
      %280 = vector.load %arg3[%c0_112, %c0_113] : memref<1x32xf32, #tpu.memory_space<vmem>>, vector<1x32xf32>
      %c0_114 = arith.constant 0 : index
      %c0_115 = arith.constant 0 : index
      %281 = vector.load %arg4[%c0_114, %c0_115] : memref<1x32xf32, #tpu.memory_space<vmem>>, vector<1x32xf32>
      %cst_116 = arith.constant dense<0.000000e+00> : vector<16xf32>
      %282 = vector.multi_reduction <add>, %279, %cst_116 [1] : vector<16x32xf32> to vector<16xf32>
      %283 = vector.shape_cast %282 : vector<16xf32> to vector<16x1xf32>
      %cst_117 = arith.constant 3.200000e+01 : f32
      %284 = vector.broadcast %cst_117 : f32 to vector<16x1xf32>
      %285 = arith.divf %283, %284 : vector<16x1xf32>
      %286 = vector.broadcast %285 : vector<16x1xf32> to vector<16x32xf32>
      %287 = arith.subf %279, %286 : vector<16x32xf32>
      %288 = arith.mulf %287, %287 : vector<16x32xf32>
      %cst_118 = arith.constant dense<0.000000e+00> : vector<16xf32>
      %289 = vector.multi_reduction <add>, %288, %cst_118 [1] : vector<16x32xf32> to vector<16xf32>
      %290 = vector.shape_cast %289 : vector<16xf32> to vector<16x1xf32>
      %cst_119 = arith.constant 3.200000e+01 : f32
      %291 = vector.broadcast %cst_119 : f32 to vector<16x1xf32>
      %292 = arith.divf %290, %291 : vector<16x1xf32>
      %293 = vector.broadcast %285 : vector<16x1xf32> to vector<16x32xf32>
      %294 = arith.subf %279, %293 : vector<16x32xf32>
      %cst_120 = arith.constant 9.99999996E-13 : f32
      %295 = vector.broadcast %cst_120 : f32 to vector<16x1xf32>
      %296 = arith.addf %292, %295 : vector<16x1xf32>
      %297 = math.rsqrt %296 : vector<16x1xf32>
      %298 = vector.broadcast %297 : vector<16x1xf32> to vector<16x32xf32>
      %299 = arith.mulf %294, %298 : vector<16x32xf32>
      %300 = vector.broadcast %280 : vector<1x32xf32> to vector<16x32xf32>
      %301 = arith.mulf %299, %300 : vector<16x32xf32>
      %302 = vector.broadcast %281 : vector<1x32xf32> to vector<16x32xf32>
      %303 = arith.addf %301, %302 : vector<16x32xf32>
      %c0_121 = arith.constant 0 : index
      %c0_122 = arith.constant 0 : index
      %304 = vector.load %arg24[%c0_121, %c0_122] : memref<16x32xf32, #tpu.memory_space<vmem>>, vector<16x32xf32>
      tpu.vector_store %arg24[%c0_121, %c0_122], %303 {strides = array<i32>} : memref<16x32xf32, #tpu.memory_space<vmem>>, vector<16x32xf32>,
      %cst_123 = arith.constant 0.000000e+00 : f32
      %305 = vector.broadcast %cst_123 : f32 to vector<2x4xf32>
      %c0_124 = arith.constant 0 : index
      %c0_125 = arith.constant 0 : index
      %306 = vector.load %arg22[%c0_124, %c0_125] : memref<2x4xf32, #tpu.memory_space<vmem>>, vector<2x4xf32>
      tpu.vector_store %arg22[%c0_124, %c0_125], %305 {strides = array<i32>} : memref<2x4xf32, #tpu.memory_space<vmem>>, vector<2x4xf32>,
      %cst_126 = arith.constant 0.000000e+00 : f32
      %307 = vector.broadcast %cst_126 : f32 to vector<1x1xf32>
      %c0_127 = arith.constant 0 : index
      %c0_128 = arith.constant 0 : index
      %308 = vector.load %arg23[%c0_127, %c0_128] : memref<1x1xf32, #tpu.memory_space<vmem>>, vector<1x1xf32>
      tpu.vector_store %arg23[%c0_127, %c0_128], %307 {strides = array<i32>} : memref<1x1xf32, #tpu.memory_space<vmem>>, vector<1x1xf32>,
    } else {
    }
    %c0 = arith.constant 0 : index
    %c0_1 = arith.constant 0 : index
    %3 = vector.load %arg24[%c0, %c0_1] : memref<16x32xf32, #tpu.memory_space<vmem>>, vector<16x32xf32>
    %c0_2 = arith.constant 0 : index
    %c0_3 = arith.constant 0 : index
    %c0_4 = arith.constant 0 : index
    %4 = vector.load %arg5[%c0_2, %c0_3, %c0_4] : memref<1x32x96xf32, #tpu.memory_space<vmem>>, vector<1x32x96xf32>
    %5 = vector.shape_cast %4 : vector<1x32x96xf32> to vector<32x96xf32>
    %cst = arith.constant dense<0.000000e+00> : vector<16x96xf32>
    %6 = tpu.matmul %3, %5, %cst {dimension_numbers = #tpu.dot_dimension_numbers<[1], [0], [0], [1], [0, 0, 1, 1], [], []>} : vector<16x32xf32>, vector<32x96xf32>, vector<16x96xf32> -> vector<16x96xf32>
    %c0_5 = arith.constant 0 : index
    %c0_6 = arith.constant 0 : index
    %c0_7 = arith.constant 0 : index
    %7 = vector.load %arg6[%c0_5, %c0_6, %c0_7] : memref<1x1x96xf32, #tpu.memory_space<vmem>>, vector<1x1x96xf32>
    %8 = vector.shape_cast %7 : vector<1x1x96xf32> to vector<1x96xf32>
    %9 = vector.broadcast %8 : vector<1x96xf32> to vector<16x96xf32>
    %10 = arith.addf %6, %9 : vector<16x96xf32>
    %c0_8 = arith.constant 0 : index
    %c0_9 = arith.constant 0 : index
    %c0_10 = arith.constant 0 : index
    %11 = vector.load %arg7[%c0_8, %c0_9, %c0_10] : memref<1x32x32xf32, #tpu.memory_space<vmem>>, vector<1x32x32xf32>
    %12 = vector.shape_cast %11 : vector<1x32x32xf32> to vector<32x32xf32>
    %c0_11 = arith.constant 0 : index
    %c0_12 = arith.constant 0 : index
    %13 = vector.load %arg2[%c0_11, %c0_12] : memref<2x8xf32, #tpu.memory_space<vmem>>, vector<1x8xf32>
    %14 = vector.shape_cast %13 : vector<1x8xf32> to vector<1x8xf32>
    %15 = vector.broadcast %14 : vector<1x8xf32> to vector<8x8xf32>
    %cst_13 = arith.constant 0.000000e+00 : f32
    %16 = vector.broadcast %cst_13 : f32 to vector<8x32xf32>
    %17 = vector.extract_strided_slice %10 {offsets = [0, 0], sizes = [8, 8], strides = [1, 1]} : vector<16x96xf32> to vector<8x8xf32>
    %18 = vector.extract_strided_slice %10 {offsets = [0, 32], sizes = [8, 8], strides = [1, 1]} : vector<16x96xf32> to vector<8x8xf32>
    %19 = vector.extract_strided_slice %10 {offsets = [0, 64], sizes = [8, 8], strides = [1, 1]} : vector<16x96xf32> to vector<8x8xf32>
    %cst_14 = arith.constant dense<0.000000e+00> : vector<8x8xf32>
    %20 = tpu.matmul %17, %18, %cst_14 {dimension_numbers = #tpu.dot_dimension_numbers<[1], [1], [0], [0], [0, 0, 1, 0], [], []>} : vector<8x8xf32>, vector<8x8xf32>, vector<8x8xf32> -> vector<8x8xf32>
    %cst_15 = arith.constant 0.353553385 : f32
    %21 = vector.broadcast %cst_15 : f32 to vector<8x8xf32>
    %22 = arith.mulf %20, %21 : vector<8x8xf32>
    %23 = arith.addf %22, %15 : vector<8x8xf32>
    %cst_16 = arith.constant dense<0xFF800000> : vector<8xf32>
    %24 = vector.multi_reduction <maximumf>, %23, %cst_16 [1] : vector<8x8xf32> to vector<8xf32>
    %25 = vector.shape_cast %24 : vector<8xf32> to vector<8x1xf32>
    %26 = vector.broadcast %25 : vector<8x1xf32> to vector<8x8xf32>
    %27 = arith.subf %23, %26 : vector<8x8xf32>
    %28 = math.exp %27 : vector<8x8xf32>
    %cst_17 = arith.constant dense<0.000000e+00> : vector<8xf32>
    %29 = vector.multi_reduction <add>, %28, %cst_17 [1] : vector<8x8xf32> to vector<8xf32>
    %30 = vector.shape_cast %29 : vector<8xf32> to vector<8x1xf32>
    %31 = tpu.reciprocal %30 {approx = true} : vector<8x1xf32> -> vector<8x1xf32>
    %32 = vector.broadcast %31 : vector<8x1xf32> to vector<8x8xf32>
    %33 = arith.mulf %28, %32 : vector<8x8xf32>
    %34 = vector.extract_strided_slice %12 {offsets = [0, 0], sizes = [8, 32], strides = [1, 1]} : vector<32x32xf32> to vector<8x32xf32>
    %cst_18 = arith.constant dense<0.000000e+00> : vector<8x32xf32>
    %35 = tpu.matmul %19, %34, %cst_18 {dimension_numbers = #tpu.dot_dimension_numbers<[1], [0], [0], [1], [0, 0, 1, 1], [], []>} : vector<8x8xf32>, vector<8x32xf32>, vector<8x32xf32> -> vector<8x32xf32>
    %cst_19 = arith.constant dense<0.000000e+00> : vector<8x32xf32>
    %36 = tpu.matmul %33, %35, %cst_19 {dimension_numbers = #tpu.dot_dimension_numbers<[1], [0], [0], [1], [0, 0, 1, 1], [], []>} : vector<8x8xf32>, vector<8x32xf32>, vector<8x32xf32> -> vector<8x32xf32>
    %37 = arith.addf %16, %36 : vector<8x32xf32>
    %38 = vector.extract_strided_slice %10 {offsets = [0, 8], sizes = [8, 8], strides = [1, 1]} : vector<16x96xf32> to vector<8x8xf32>
    %39 = vector.extract_strided_slice %10 {offsets = [0, 40], sizes = [8, 8], strides = [1, 1]} : vector<16x96xf32> to vector<8x8xf32>
    %40 = vector.extract_strided_slice %10 {offsets = [0, 72], sizes = [8, 8], strides = [1, 1]} : vector<16x96xf32> to vector<8x8xf32>
    %cst_20 = arith.constant dense<0.000000e+00> : vector<8x8xf32>
    %41 = tpu.matmul %38, %39, %cst_20 {dimension_numbers = #tpu.dot_dimension_numbers<[1], [1], [0], [0], [0, 0, 1, 0], [], []>} : vector<8x8xf32>, vector<8x8xf32>, vector<8x8xf32> -> vector<8x8xf32>
    %cst_21 = arith.constant 0.353553385 : f32
    %42 = vector.broadcast %cst_21 : f32 to vector<8x8xf32>
    %43 = arith.mulf %41, %42 : vector<8x8xf32>
    %44 = arith.addf %43, %15 : vector<8x8xf32>
    %cst_22 = arith.constant dense<0xFF800000> : vector<8xf32>
    %45 = vector.multi_reduction <maximumf>, %44, %cst_22 [1] : vector<8x8xf32> to vector<8xf32>
    %46 = vector.shape_cast %45 : vector<8xf32> to vector<8x1xf32>
    %47 = vector.broadcast %46 : vector<8x1xf32> to vector<8x8xf32>
    %48 = arith.subf %44, %47 : vector<8x8xf32>
    %49 = math.exp %48 : vector<8x8xf32>
    %cst_23 = arith.constant dense<0.000000e+00> : vector<8xf32>
    %50 = vector.multi_reduction <add>, %49, %cst_23 [1] : vector<8x8xf32> to vector<8xf32>
    %51 = vector.shape_cast %50 : vector<8xf32> to vector<8x1xf32>
    %52 = tpu.reciprocal %51 {approx = true} : vector<8x1xf32> -> vector<8x1xf32>
    %53 = vector.broadcast %52 : vector<8x1xf32> to vector<8x8xf32>
    %54 = arith.mulf %49, %53 : vector<8x8xf32>
    %55 = vector.extract_strided_slice %12 {offsets = [8, 0], sizes = [8, 32], strides = [1, 1]} : vector<32x32xf32> to vector<8x32xf32>
    %cst_24 = arith.constant dense<0.000000e+00> : vector<8x32xf32>
    %56 = tpu.matmul %40, %55, %cst_24 {dimension_numbers = #tpu.dot_dimension_numbers<[1], [0], [0], [1], [0, 0, 1, 1], [], []>} : vector<8x8xf32>, vector<8x32xf32>, vector<8x32xf32> -> vector<8x32xf32>
    %cst_25 = arith.constant dense<0.000000e+00> : vector<8x32xf32>
    %57 = tpu.matmul %54, %56, %cst_25 {dimension_numbers = #tpu.dot_dimension_numbers<[1], [0], [0], [1], [0, 0, 1, 1], [], []>} : vector<8x8xf32>, vector<8x32xf32>, vector<8x32xf32> -> vector<8x32xf32>
    %58 = arith.addf %37, %57 : vector<8x32xf32>
    %59 = vector.extract_strided_slice %10 {offsets = [0, 16], sizes = [8, 8], strides = [1, 1]} : vector<16x96xf32> to vector<8x8xf32>
    %60 = vector.extract_strided_slice %10 {offsets = [0, 48], sizes = [8, 8], strides = [1, 1]} : vector<16x96xf32> to vector<8x8xf32>
    %61 = vector.extract_strided_slice %10 {offsets = [0, 80], sizes = [8, 8], strides = [1, 1]} : vector<16x96xf32> to vector<8x8xf32>
    %cst_26 = arith.constant dense<0.000000e+00> : vector<8x8xf32>
    %62 = tpu.matmul %59, %60, %cst_26 {dimension_numbers = #tpu.dot_dimension_numbers<[1], [1], [0], [0], [0, 0, 1, 0], [], []>} : vector<8x8xf32>, vector<8x8xf32>, vector<8x8xf32> -> vector<8x8xf32>
    %cst_27 = arith.constant 0.353553385 : f32
    %63 = vector.broadcast %cst_27 : f32 to vector<8x8xf32>
    %64 = arith.mulf %62, %63 : vector<8x8xf32>
    %65 = arith.addf %64, %15 : vector<8x8xf32>
    %cst_28 = arith.constant dense<0xFF800000> : vector<8xf32>
    %66 = vector.multi_reduction <maximumf>, %65, %cst_28 [1] : vector<8x8xf32> to vector<8xf32>
    %67 = vector.shape_cast %66 : vector<8xf32> to vector<8x1xf32>
    %68 = vector.broadcast %67 : vector<8x1xf32> to vector<8x8xf32>
    %69 = arith.subf %65, %68 : vector<8x8xf32>
    %70 = math.exp %69 : vector<8x8xf32>
    %cst_29 = arith.constant dense<0.000000e+00> : vector<8xf32>
    %71 = vector.multi_reduction <add>, %70, %cst_29 [1] : vector<8x8xf32> to vector<8xf32>
    %72 = vector.shape_cast %71 : vector<8xf32> to vector<8x1xf32>
    %73 = tpu.reciprocal %72 {approx = true} : vector<8x1xf32> -> vector<8x1xf32>
    %74 = vector.broadcast %73 : vector<8x1xf32> to vector<8x8xf32>
    %75 = arith.mulf %70, %74 : vector<8x8xf32>
    %76 = vector.extract_strided_slice %12 {offsets = [16, 0], sizes = [8, 32], strides = [1, 1]} : vector<32x32xf32> to vector<8x32xf32>
    %cst_30 = arith.constant dense<0.000000e+00> : vector<8x32xf32>
    %77 = tpu.matmul %61, %76, %cst_30 {dimension_numbers = #tpu.dot_dimension_numbers<[1], [0], [0], [1], [0, 0, 1, 1], [], []>} : vector<8x8xf32>, vector<8x32xf32>, vector<8x32xf32> -> vector<8x32xf32>
    %cst_31 = arith.constant dense<0.000000e+00> : vector<8x32xf32>
    %78 = tpu.matmul %75, %77, %cst_31 {dimension_numbers = #tpu.dot_dimension_numbers<[1], [0], [0], [1], [0, 0, 1, 1], [], []>} : vector<8x8xf32>, vector<8x32xf32>, vector<8x32xf32> -> vector<8x32xf32>
    %79 = arith.addf %58, %78 : vector<8x32xf32>
    %80 = vector.extract_strided_slice %10 {offsets = [0, 24], sizes = [8, 8], strides = [1, 1]} : vector<16x96xf32> to vector<8x8xf32>
    %81 = vector.extract_strided_slice %10 {offsets = [0, 56], sizes = [8, 8], strides = [1, 1]} : vector<16x96xf32> to vector<8x8xf32>
    %82 = vector.extract_strided_slice %10 {offsets = [0, 88], sizes = [8, 8], strides = [1, 1]} : vector<16x96xf32> to vector<8x8xf32>
    %cst_32 = arith.constant dense<0.000000e+00> : vector<8x8xf32>
    %83 = tpu.matmul %80, %81, %cst_32 {dimension_numbers = #tpu.dot_dimension_numbers<[1], [1], [0], [0], [0, 0, 1, 0], [], []>} : vector<8x8xf32>, vector<8x8xf32>, vector<8x8xf32> -> vector<8x8xf32>
    %cst_33 = arith.constant 0.353553385 : f32
    %84 = vector.broadcast %cst_33 : f32 to vector<8x8xf32>
    %85 = arith.mulf %83, %84 : vector<8x8xf32>
    %86 = arith.addf %85, %15 : vector<8x8xf32>
    %cst_34 = arith.constant dense<0xFF800000> : vector<8xf32>
    %87 = vector.multi_reduction <maximumf>, %86, %cst_34 [1] : vector<8x8xf32> to vector<8xf32>
    %88 = vector.shape_cast %87 : vector<8xf32> to vector<8x1xf32>
    %89 = vector.broadcast %88 : vector<8x1xf32> to vector<8x8xf32>
    %90 = arith.subf %86, %89 : vector<8x8xf32>
    %91 = math.exp %90 : vector<8x8xf32>
    %cst_35 = arith.constant dense<0.000000e+00> : vector<8xf32>
    %92 = vector.multi_reduction <add>, %91, %cst_35 [1] : vector<8x8xf32> to vector<8xf32>
    %93 = vector.shape_cast %92 : vector<8xf32> to vector<8x1xf32>
    %94 = tpu.reciprocal %93 {approx = true} : vector<8x1xf32> -> vector<8x1xf32>
    %95 = vector.broadcast %94 : vector<8x1xf32> to vector<8x8xf32>
    %96 = arith.mulf %91, %95 : vector<8x8xf32>
    %97 = vector.extract_strided_slice %12 {offsets = [24, 0], sizes = [8, 32], strides = [1, 1]} : vector<32x32xf32> to vector<8x32xf32>
    %cst_36 = arith.constant dense<0.000000e+00> : vector<8x32xf32>
    %98 = tpu.matmul %82, %97, %cst_36 {dimension_numbers = #tpu.dot_dimension_numbers<[1], [0], [0], [1], [0, 0, 1, 1], [], []>} : vector<8x8xf32>, vector<8x32xf32>, vector<8x32xf32> -> vector<8x32xf32>
    %cst_37 = arith.constant dense<0.000000e+00> : vector<8x32xf32>
    %99 = tpu.matmul %96, %98, %cst_37 {dimension_numbers = #tpu.dot_dimension_numbers<[1], [0], [0], [1], [0, 0, 1, 1], [], []>} : vector<8x8xf32>, vector<8x32xf32>, vector<8x32xf32> -> vector<8x32xf32>
    %100 = arith.addf %79, %99 : vector<8x32xf32>
    %c1 = arith.constant 1 : index
    %c0_38 = arith.constant 0 : index
    %101 = vector.load %arg2[%c1, %c0_38] : memref<2x8xf32, #tpu.memory_space<vmem>>, vector<1x8xf32>
    %102 = vector.shape_cast %101 : vector<1x8xf32> to vector<1x8xf32>
    %103 = vector.broadcast %102 : vector<1x8xf32> to vector<8x8xf32>
    %cst_39 = arith.constant 0.000000e+00 : f32
    %104 = vector.broadcast %cst_39 : f32 to vector<8x32xf32>
    %105 = vector.extract_strided_slice %10 {offsets = [8, 0], sizes = [8, 8], strides = [1, 1]} : vector<16x96xf32> to vector<8x8xf32>
    %106 = vector.extract_strided_slice %10 {offsets = [8, 32], sizes = [8, 8], strides = [1, 1]} : vector<16x96xf32> to vector<8x8xf32>
    %107 = vector.extract_strided_slice %10 {offsets = [8, 64], sizes = [8, 8], strides = [1, 1]} : vector<16x96xf32> to vector<8x8xf32>
    %cst_40 = arith.constant dense<0.000000e+00> : vector<8x8xf32>
    %108 = tpu.matmul %105, %106, %cst_40 {dimension_numbers = #tpu.dot_dimension_numbers<[1], [1], [0], [0], [0, 0, 1, 0], [], []>} : vector<8x8xf32>, vector<8x8xf32>, vector<8x8xf32> -> vector<8x8xf32>
    %cst_41 = arith.constant 0.353553385 : f32
    %109 = vector.broadcast %cst_41 : f32 to vector<8x8xf32>
    %110 = arith.mulf %108, %109 : vector<8x8xf32>
    %111 = arith.addf %110, %103 : vector<8x8xf32>
    %cst_42 = arith.constant dense<0xFF800000> : vector<8xf32>
    %112 = vector.multi_reduction <maximumf>, %111, %cst_42 [1] : vector<8x8xf32> to vector<8xf32>
    %113 = vector.shape_cast %112 : vector<8xf32> to vector<8x1xf32>
    %114 = vector.broadcast %113 : vector<8x1xf32> to vector<8x8xf32>
    %115 = arith.subf %111, %114 : vector<8x8xf32>
    %116 = math.exp %115 : vector<8x8xf32>
    %cst_43 = arith.constant dense<0.000000e+00> : vector<8xf32>
    %117 = vector.multi_reduction <add>, %116, %cst_43 [1] : vector<8x8xf32> to vector<8xf32>
    %118 = vector.shape_cast %117 : vector<8xf32> to vector<8x1xf32>
    %119 = tpu.reciprocal %118 {approx = true} : vector<8x1xf32> -> vector<8x1xf32>
    %120 = vector.broadcast %119 : vector<8x1xf32> to vector<8x8xf32>
    %121 = arith.mulf %116, %120 : vector<8x8xf32>
    %122 = vector.extract_strided_slice %12 {offsets = [0, 0], sizes = [8, 32], strides = [1, 1]} : vector<32x32xf32> to vector<8x32xf32>
    %cst_44 = arith.constant dense<0.000000e+00> : vector<8x32xf32>
    %123 = tpu.matmul %107, %122, %cst_44 {dimension_numbers = #tpu.dot_dimension_numbers<[1], [0], [0], [1], [0, 0, 1, 1], [], []>} : vector<8x8xf32>, vector<8x32xf32>, vector<8x32xf32> -> vector<8x32xf32>
    %cst_45 = arith.constant dense<0.000000e+00> : vector<8x32xf32>
    %124 = tpu.matmul %121, %123, %cst_45 {dimension_numbers = #tpu.dot_dimension_numbers<[1], [0], [0], [1], [0, 0, 1, 1], [], []>} : vector<8x8xf32>, vector<8x32xf32>, vector<8x32xf32> -> vector<8x32xf32>
    %125 = arith.addf %104, %124 : vector<8x32xf32>
    %126 = vector.extract_strided_slice %10 {offsets = [8, 8], sizes = [8, 8], strides = [1, 1]} : vector<16x96xf32> to vector<8x8xf32>
    %127 = vector.extract_strided_slice %10 {offsets = [8, 40], sizes = [8, 8], strides = [1, 1]} : vector<16x96xf32> to vector<8x8xf32>
    %128 = vector.extract_strided_slice %10 {offsets = [8, 72], sizes = [8, 8], strides = [1, 1]} : vector<16x96xf32> to vector<8x8xf32>
    %cst_46 = arith.constant dense<0.000000e+00> : vector<8x8xf32>
    %129 = tpu.matmul %126, %127, %cst_46 {dimension_numbers = #tpu.dot_dimension_numbers<[1], [1], [0], [0], [0, 0, 1, 0], [], []>} : vector<8x8xf32>, vector<8x8xf32>, vector<8x8xf32> -> vector<8x8xf32>
    %cst_47 = arith.constant 0.353553385 : f32
    %130 = vector.broadcast %cst_47 : f32 to vector<8x8xf32>
    %131 = arith.mulf %129, %130 : vector<8x8xf32>
    %132 = arith.addf %131, %103 : vector<8x8xf32>
    %cst_48 = arith.constant dense<0xFF800000> : vector<8xf32>
    %133 = vector.multi_reduction <maximumf>, %132, %cst_48 [1] : vector<8x8xf32> to vector<8xf32>
    %134 = vector.shape_cast %133 : vector<8xf32> to vector<8x1xf32>
    %135 = vector.broadcast %134 : vector<8x1xf32> to vector<8x8xf32>
    %136 = arith.subf %132, %135 : vector<8x8xf32>
    %137 = math.exp %136 : vector<8x8xf32>
    %cst_49 = arith.constant dense<0.000000e+00> : vector<8xf32>
    %138 = vector.multi_reduction <add>, %137, %cst_49 [1] : vector<8x8xf32> to vector<8xf32>
    %139 = vector.shape_cast %138 : vector<8xf32> to vector<8x1xf32>
    %140 = tpu.reciprocal %139 {approx = true} : vector<8x1xf32> -> vector<8x1xf32>
    %141 = vector.broadcast %140 : vector<8x1xf32> to vector<8x8xf32>
    %142 = arith.mulf %137, %141 : vector<8x8xf32>
    %143 = vector.extract_strided_slice %12 {offsets = [8, 0], sizes = [8, 32], strides = [1, 1]} : vector<32x32xf32> to vector<8x32xf32>
    %cst_50 = arith.constant dense<0.000000e+00> : vector<8x32xf32>
    %144 = tpu.matmul %128, %143, %cst_50 {dimension_numbers = #tpu.dot_dimension_numbers<[1], [0], [0], [1], [0, 0, 1, 1], [], []>} : vector<8x8xf32>, vector<8x32xf32>, vector<8x32xf32> -> vector<8x32xf32>
    %cst_51 = arith.constant dense<0.000000e+00> : vector<8x32xf32>
    %145 = tpu.matmul %142, %144, %cst_51 {dimension_numbers = #tpu.dot_dimension_numbers<[1], [0], [0], [1], [0, 0, 1, 1], [], []>} : vector<8x8xf32>, vector<8x32xf32>, vector<8x32xf32> -> vector<8x32xf32>
    %146 = arith.addf %125, %145 : vector<8x32xf32>
    %147 = vector.extract_strided_slice %10 {offsets = [8, 16], sizes = [8, 8], strides = [1, 1]} : vector<16x96xf32> to vector<8x8xf32>
    %148 = vector.extract_strided_slice %10 {offsets = [8, 48], sizes = [8, 8], strides = [1, 1]} : vector<16x96xf32> to vector<8x8xf32>
    %149 = vector.extract_strided_slice %10 {offsets = [8, 80], sizes = [8, 8], strides = [1, 1]} : vector<16x96xf32> to vector<8x8xf32>
    %cst_52 = arith.constant dense<0.000000e+00> : vector<8x8xf32>
    %150 = tpu.matmul %147, %148, %cst_52 {dimension_numbers = #tpu.dot_dimension_numbers<[1], [1], [0], [0], [0, 0, 1, 0], [], []>} : vector<8x8xf32>, vector<8x8xf32>, vector<8x8xf32> -> vector<8x8xf32>
    %cst_53 = arith.constant 0.353553385 : f32
    %151 = vector.broadcast %cst_53 : f32 to vector<8x8xf32>
    %152 = arith.mulf %150, %151 : vector<8x8xf32>
    %153 = arith.addf %152, %103 : vector<8x8xf32>
    %cst_54 = arith.constant dense<0xFF800000> : vector<8xf32>
    %154 = vector.multi_reduction <maximumf>, %153, %cst_54 [1] : vector<8x8xf32> to vector<8xf32>
    %155 = vector.shape_cast %154 : vector<8xf32> to vector<8x1xf32>
    %156 = vector.broadcast %155 : vector<8x1xf32> to vector<8x8xf32>
    %157 = arith.subf %153, %156 : vector<8x8xf32>
    %158 = math.exp %157 : vector<8x8xf32>
    %cst_55 = arith.constant dense<0.000000e+00> : vector<8xf32>
    %159 = vector.multi_reduction <add>, %158, %cst_55 [1] : vector<8x8xf32> to vector<8xf32>
    %160 = vector.shape_cast %159 : vector<8xf32> to vector<8x1xf32>
    %161 = tpu.reciprocal %160 {approx = true} : vector<8x1xf32> -> vector<8x1xf32>
    %162 = vector.broadcast %161 : vector<8x1xf32> to vector<8x8xf32>
    %163 = arith.mulf %158, %162 : vector<8x8xf32>
    %164 = vector.extract_strided_slice %12 {offsets = [16, 0], sizes = [8, 32], strides = [1, 1]} : vector<32x32xf32> to vector<8x32xf32>
    %cst_56 = arith.constant dense<0.000000e+00> : vector<8x32xf32>
    %165 = tpu.matmul %149, %164, %cst_56 {dimension_numbers = #tpu.dot_dimension_numbers<[1], [0], [0], [1], [0, 0, 1, 1], [], []>} : vector<8x8xf32>, vector<8x32xf32>, vector<8x32xf32> -> vector<8x32xf32>
    %cst_57 = arith.constant dense<0.000000e+00> : vector<8x32xf32>
    %166 = tpu.matmul %163, %165, %cst_57 {dimension_numbers = #tpu.dot_dimension_numbers<[1], [0], [0], [1], [0, 0, 1, 1], [], []>} : vector<8x8xf32>, vector<8x32xf32>, vector<8x32xf32> -> vector<8x32xf32>
    %167 = arith.addf %146, %166 : vector<8x32xf32>
    %168 = vector.extract_strided_slice %10 {offsets = [8, 24], sizes = [8, 8], strides = [1, 1]} : vector<16x96xf32> to vector<8x8xf32>
    %169 = vector.extract_strided_slice %10 {offsets = [8, 56], sizes = [8, 8], strides = [1, 1]} : vector<16x96xf32> to vector<8x8xf32>
    %170 = vector.extract_strided_slice %10 {offsets = [8, 88], sizes = [8, 8], strides = [1, 1]} : vector<16x96xf32> to vector<8x8xf32>
    %cst_58 = arith.constant dense<0.000000e+00> : vector<8x8xf32>
    %171 = tpu.matmul %168, %169, %cst_58 {dimension_numbers = #tpu.dot_dimension_numbers<[1], [1], [0], [0], [0, 0, 1, 0], [], []>} : vector<8x8xf32>, vector<8x8xf32>, vector<8x8xf32> -> vector<8x8xf32>
    %cst_59 = arith.constant 0.353553385 : f32
    %172 = vector.broadcast %cst_59 : f32 to vector<8x8xf32>
    %173 = arith.mulf %171, %172 : vector<8x8xf32>
    %174 = arith.addf %173, %103 : vector<8x8xf32>
    %cst_60 = arith.constant dense<0xFF800000> : vector<8xf32>
    %175 = vector.multi_reduction <maximumf>, %174, %cst_60 [1] : vector<8x8xf32> to vector<8xf32>
    %176 = vector.shape_cast %175 : vector<8xf32> to vector<8x1xf32>
    %177 = vector.broadcast %176 : vector<8x1xf32> to vector<8x8xf32>
    %178 = arith.subf %174, %177 : vector<8x8xf32>
    %179 = math.exp %178 : vector<8x8xf32>
    %cst_61 = arith.constant dense<0.000000e+00> : vector<8xf32>
    %180 = vector.multi_reduction <add>, %179, %cst_61 [1] : vector<8x8xf32> to vector<8xf32>
    %181 = vector.shape_cast %180 : vector<8xf32> to vector<8x1xf32>
    %182 = tpu.reciprocal %181 {approx = true} : vector<8x1xf32> -> vector<8x1xf32>
    %183 = vector.broadcast %182 : vector<8x1xf32> to vector<8x8xf32>
    %184 = arith.mulf %179, %183 : vector<8x8xf32>
    %185 = vector.extract_strided_slice %12 {offsets = [24, 0], sizes = [8, 32], strides = [1, 1]} : vector<32x32xf32> to vector<8x32xf32>
    %cst_62 = arith.constant dense<0.000000e+00> : vector<8x32xf32>
    %186 = tpu.matmul %170, %185, %cst_62 {dimension_numbers = #tpu.dot_dimension_numbers<[1], [0], [0], [1], [0, 0, 1, 1], [], []>} : vector<8x8xf32>, vector<8x32xf32>, vector<8x32xf32> -> vector<8x32xf32>
    %cst_63 = arith.constant dense<0.000000e+00> : vector<8x32xf32>
    %187 = tpu.matmul %184, %186, %cst_63 {dimension_numbers = #tpu.dot_dimension_numbers<[1], [0], [0], [1], [0, 0, 1, 1], [], []>} : vector<8x8xf32>, vector<8x32xf32>, vector<8x32xf32> -> vector<8x32xf32>
    %188 = arith.addf %167, %187 : vector<8x32xf32>
    %189 = tpu.concatenate %100, %188 in 0 : vector<8x32xf32>, vector<8x32xf32> -> vector<16x32xf32>
    %c0_64 = arith.constant 0 : index
    %c0_65 = arith.constant 0 : index
    %c0_66 = arith.constant 0 : index
    %190 = vector.load %arg8[%c0_64, %c0_65, %c0_66] : memref<1x1x32xf32, #tpu.memory_space<vmem>>, vector<1x1x32xf32>
    %191 = vector.shape_cast %190 : vector<1x1x32xf32> to vector<1x32xf32>
    %192 = vector.broadcast %191 : vector<1x32xf32> to vector<16x32xf32>
    %193 = arith.addf %189, %192 : vector<16x32xf32>
    %194 = arith.addf %3, %193 : vector<16x32xf32>
    %c0_67 = arith.constant 0 : index
    %c0_68 = arith.constant 0 : index
    %c0_69 = arith.constant 0 : index
    %195 = vector.load %arg9[%c0_67, %c0_68, %c0_69] : memref<1x1x32xf32, #tpu.memory_space<vmem>>, vector<1x1x32xf32>
    %196 = vector.shape_cast %195 : vector<1x1x32xf32> to vector<1x32xf32>
    %c0_70 = arith.constant 0 : index
    %c0_71 = arith.constant 0 : index
    %c0_72 = arith.constant 0 : index
    %197 = vector.load %arg10[%c0_70, %c0_71, %c0_72] : memref<1x1x32xf32, #tpu.memory_space<vmem>>, vector<1x1x32xf32>
    %198 = vector.shape_cast %197 : vector<1x1x32xf32> to vector<1x32xf32>
    %cst_73 = arith.constant dense<0.000000e+00> : vector<16xf32>
    %199 = vector.multi_reduction <add>, %194, %cst_73 [1] : vector<16x32xf32> to vector<16xf32>
    %200 = vector.shape_cast %199 : vector<16xf32> to vector<16x1xf32>
    %cst_74 = arith.constant 3.200000e+01 : f32
    %201 = vector.broadcast %cst_74 : f32 to vector<16x1xf32>
    %202 = arith.divf %200, %201 : vector<16x1xf32>
    %203 = vector.broadcast %202 : vector<16x1xf32> to vector<16x32xf32>
    %204 = arith.subf %194, %203 : vector<16x32xf32>
    %205 = arith.mulf %204, %204 : vector<16x32xf32>
    %cst_75 = arith.constant dense<0.000000e+00> : vector<16xf32>
    %206 = vector.multi_reduction <add>, %205, %cst_75 [1] : vector<16x32xf32> to vector<16xf32>
    %207 = vector.shape_cast %206 : vector<16xf32> to vector<16x1xf32>
    %cst_76 = arith.constant 3.200000e+01 : f32
    %208 = vector.broadcast %cst_76 : f32 to vector<16x1xf32>
    %209 = arith.divf %207, %208 : vector<16x1xf32>
    %210 = vector.broadcast %202 : vector<16x1xf32> to vector<16x32xf32>
    %211 = arith.subf %194, %210 : vector<16x32xf32>
    %cst_77 = arith.constant 9.99999996E-13 : f32
    %212 = vector.broadcast %cst_77 : f32 to vector<16x1xf32>
    %213 = arith.addf %209, %212 : vector<16x1xf32>
    %214 = math.rsqrt %213 : vector<16x1xf32>
    %215 = vector.broadcast %214 : vector<16x1xf32> to vector<16x32xf32>
    %216 = arith.mulf %211, %215 : vector<16x32xf32>
    %217 = vector.broadcast %196 : vector<1x32xf32> to vector<16x32xf32>
    %218 = arith.mulf %216, %217 : vector<16x32xf32>
    %219 = vector.broadcast %198 : vector<1x32xf32> to vector<16x32xf32>
    %220 = arith.addf %218, %219 : vector<16x32xf32>
    %c0_78 = arith.constant 0 : index
    %c0_79 = arith.constant 0 : index
    %c0_80 = arith.constant 0 : index
    %221 = vector.load %arg11[%c0_78, %c0_79, %c0_80] : memref<1x32x64xf32, #tpu.memory_space<vmem>>, vector<1x32x64xf32>
    %222 = vector.shape_cast %221 : vector<1x32x64xf32> to vector<32x64xf32>
    %cst_81 = arith.constant dense<0.000000e+00> : vector<16x64xf32>
    %223 = tpu.matmul %220, %222, %cst_81 {dimension_numbers = #tpu.dot_dimension_numbers<[1], [0], [0], [1], [0, 0, 1, 1], [], []>} : vector<16x32xf32>, vector<32x64xf32>, vector<16x64xf32> -> vector<16x64xf32>
    %c0_82 = arith.constant 0 : index
    %c0_83 = arith.constant 0 : index
    %c0_84 = arith.constant 0 : index
    %224 = vector.load %arg12[%c0_82, %c0_83, %c0_84] : memref<1x1x64xf32, #tpu.memory_space<vmem>>, vector<1x1x64xf32>
    %225 = vector.shape_cast %224 : vector<1x1x64xf32> to vector<1x64xf32>
    %226 = vector.broadcast %225 : vector<1x64xf32> to vector<16x64xf32>
    %227 = arith.addf %223, %226 : vector<16x64xf32>
    %228 = arith.mulf %227, %227 : vector<16x64xf32>
    %229 = arith.mulf %227, %228 : vector<16x64xf32>
    %cst_85 = arith.constant 4.471500e-02 : f32
    %230 = vector.broadcast %cst_85 : f32 to vector<16x64xf32>
    %231 = arith.mulf %230, %229 : vector<16x64xf32>
    %232 = arith.addf %227, %231 : vector<16x64xf32>
    %cst_86 = arith.constant 0.797884583 : f32
    %233 = vector.broadcast %cst_86 : f32 to vector<16x64xf32>
    %234 = arith.mulf %233, %232 : vector<16x64xf32>
    %235 = math.tanh %234 : vector<16x64xf32>
    %cst_87 = arith.constant 1.000000e+00 : f32
    %236 = vector.broadcast %cst_87 : f32 to vector<16x64xf32>
    %237 = arith.addf %236, %235 : vector<16x64xf32>
    %cst_88 = arith.constant 5.000000e-01 : f32
    %238 = vector.broadcast %cst_88 : f32 to vector<16x64xf32>
    %239 = arith.mulf %238, %237 : vector<16x64xf32>
    %240 = arith.mulf %227, %239 : vector<16x64xf32>
    %c0_89 = arith.constant 0 : index
    %c0_90 = arith.constant 0 : index
    %c0_91 = arith.constant 0 : index
    %241 = vector.load %arg13[%c0_89, %c0_90, %c0_91] : memref<1x64x32xf32, #tpu.memory_space<vmem>>, vector<1x64x32xf32>
    %242 = vector.shape_cast %241 : vector<1x64x32xf32> to vector<64x32xf32>
    %cst_92 = arith.constant dense<0.000000e+00> : vector<16x32xf32>
    %243 = tpu.matmul %240, %242, %cst_92 {dimension_numbers = #tpu.dot_dimension_numbers<[1], [0], [0], [1], [0, 0, 1, 1], [], []>} : vector<16x64xf32>, vector<64x32xf32>, vector<16x32xf32> -> vector<16x32xf32>
    %c0_93 = arith.constant 0 : index
    %c0_94 = arith.constant 0 : index
    %c0_95 = arith.constant 0 : index
    %244 = vector.load %arg14[%c0_93, %c0_94, %c0_95] : memref<1x1x32xf32, #tpu.memory_space<vmem>>, vector<1x1x32xf32>
    %245 = vector.shape_cast %244 : vector<1x1x32xf32> to vector<1x32xf32>
    %246 = vector.broadcast %245 : vector<1x32xf32> to vector<16x32xf32>
    %247 = arith.addf %243, %246 : vector<16x32xf32>
    %248 = arith.addf %220, %247 : vector<16x32xf32>
    %c0_96 = arith.constant 0 : index
    %c0_97 = arith.constant 0 : index
    %c0_98 = arith.constant 0 : index
    %249 = vector.load %arg15[%c0_96, %c0_97, %c0_98] : memref<1x1x32xf32, #tpu.memory_space<vmem>>, vector<1x1x32xf32>
    %250 = vector.shape_cast %249 : vector<1x1x32xf32> to vector<1x32xf32>
    %c0_99 = arith.constant 0 : index
    %c0_100 = arith.constant 0 : index
    %c0_101 = arith.constant 0 : index
    %251 = vector.load %arg16[%c0_99, %c0_100, %c0_101] : memref<1x1x32xf32, #tpu.memory_space<vmem>>, vector<1x1x32xf32>
    %252 = vector.shape_cast %251 : vector<1x1x32xf32> to vector<1x32xf32>
    %cst_102 = arith.constant dense<0.000000e+00> : vector<16xf32>
    %253 = vector.multi_reduction <add>, %248, %cst_102 [1] : vector<16x32xf32> to vector<16xf32>
    %254 = vector.shape_cast %253 : vector<16xf32> to vector<16x1xf32>
    %cst_103 = arith.constant 3.200000e+01 : f32
    %255 = vector.broadcast %cst_103 : f32 to vector<16x1xf32>
    %256 = arith.divf %254, %255 : vector<16x1xf32>
    %257 = vector.broadcast %256 : vector<16x1xf32> to vector<16x32xf32>
    %258 = arith.subf %248, %257 : vector<16x32xf32>
    %259 = arith.mulf %258, %258 : vector<16x32xf32>
    %cst_104 = arith.constant dense<0.000000e+00> : vector<16xf32>
    %260 = vector.multi_reduction <add>, %259, %cst_104 [1] : vector<16x32xf32> to vector<16xf32>
    %261 = vector.shape_cast %260 : vector<16xf32> to vector<16x1xf32>
    %cst_105 = arith.constant 3.200000e+01 : f32
    %262 = vector.broadcast %cst_105 : f32 to vector<16x1xf32>
    %263 = arith.divf %261, %262 : vector<16x1xf32>
    %264 = vector.broadcast %256 : vector<16x1xf32> to vector<16x32xf32>
    %265 = arith.subf %248, %264 : vector<16x32xf32>
    %cst_106 = arith.constant 9.99999996E-13 : f32
    %266 = vector.broadcast %cst_106 : f32 to vector<16x1xf32>
    %267 = arith.addf %263, %266 : vector<16x1xf32>
    %268 = math.rsqrt %267 : vector<16x1xf32>
    %269 = vector.broadcast %268 : vector<16x1xf32> to vector<16x32xf32>
    %270 = arith.mulf %265, %269 : vector<16x32xf32>
    %271 = vector.broadcast %250 : vector<1x32xf32> to vector<16x32xf32>
    %272 = arith.mulf %270, %271 : vector<16x32xf32>
    %273 = vector.broadcast %252 : vector<1x32xf32> to vector<16x32xf32>
    %274 = arith.addf %272, %273 : vector<16x32xf32>
    %c0_107 = arith.constant 0 : index
    %c0_108 = arith.constant 0 : index
    %275 = vector.load %arg24[%c0_107, %c0_108] : memref<16x32xf32, #tpu.memory_space<vmem>>, vector<16x32xf32>
    tpu.vector_store %arg24[%c0_107, %c0_108], %274 {strides = array<i32>} : memref<16x32xf32, #tpu.memory_space<vmem>>, vector<16x32xf32>,
    %c1_i32 = arith.constant 1 : i32
    %276 = arith.cmpi eq, %arg0, %c1_i32 : i32
    %277 = arith.extui %276 : i1 to i32
    %c0_i32_109 = arith.constant 0 : i32
    %278 = arith.cmpi ne, %277, %c0_i32_109 : i32
    scf.if %278 {
      %279 = vector.extract_strided_slice %274 {offsets = [0, 0], sizes = [1, 32], strides = [1, 1]} : vector<16x32xf32> to vector<1x32xf32>
      %280 = vector.extract_strided_slice %274 {offsets = [8, 0], sizes = [1, 32], strides = [1, 1]} : vector<16x32xf32> to vector<1x32xf32>
      %281 = tpu.concatenate %279, %280 in 0 : vector<1x32xf32>, vector<1x32xf32> -> vector<2x32xf32>
      %c0_110 = arith.constant 0 : index
      %c0_111 = arith.constant 0 : index
      %282 = vector.load %arg17[%c0_110, %c0_111] : memref<32x32xf32, #tpu.memory_space<vmem>>, vector<32x32xf32>
      %cst_112 = arith.constant dense<0.000000e+00> : vector<2x32xf32>
      %283 = tpu.matmul %281, %282, %cst_112 {dimension_numbers = #tpu.dot_dimension_numbers<[1], [0], [0], [1], [0, 0, 1, 1], [], []>} : vector<2x32xf32>, vector<32x32xf32>, vector<2x32xf32> -> vector<2x32xf32>
      %c0_113 = arith.constant 0 : index
      %c0_114 = arith.constant 0 : index
      %284 = vector.load %arg18[%c0_113, %c0_114] : memref<1x32xf32, #tpu.memory_space<vmem>>, vector<1x32xf32>
      %285 = vector.broadcast %284 : vector<1x32xf32> to vector<2x32xf32>
      %286 = arith.addf %283, %285 : vector<2x32xf32>
      %287 = math.tanh %286 : vector<2x32xf32>
      %c0_115 = arith.constant 0 : index
      %c0_116 = arith.constant 0 : index
      %288 = vector.load %arg19[%c0_115, %c0_116] : memref<32x4xf32, #tpu.memory_space<vmem>>, vector<32x4xf32>
      %cst_117 = arith.constant dense<0.000000e+00> : vector<2x4xf32>
      %289 = tpu.matmul %287, %288, %cst_117 {dimension_numbers = #tpu.dot_dimension_numbers<[1], [0], [0], [1], [0, 0, 1, 1], [], []>} : vector<2x32xf32>, vector<32x4xf32>, vector<2x4xf32> -> vector<2x4xf32>
      %c0_118 = arith.constant 0 : index
      %c0_119 = arith.constant 0 : index
      %290 = vector.load %arg20[%c0_118, %c0_119] : memref<1x4xf32, #tpu.memory_space<vmem>>, vector<1x4xf32>
      %291 = vector.broadcast %290 : vector<1x4xf32> to vector<2x4xf32>
      %292 = arith.addf %289, %291 : vector<2x4xf32>
      %c0_120 = arith.constant 0 : index
      %c0_121 = arith.constant 0 : index
      %293 = vector.load %arg22[%c0_120, %c0_121] : memref<2x4xf32, #tpu.memory_space<vmem>>, vector<2x4xf32>
      tpu.vector_store %arg22[%c0_120, %c0_121], %292 {strides = array<i32>} : memref<2x4xf32, #tpu.memory_space<vmem>>, vector<2x4xf32>,
      %c0_122 = arith.constant 0 : index
      %c0_123 = arith.constant 0 : index
      %294 = vector.load %arg21[%c0_122, %c0_123] : memref<2x4xf32, #tpu.memory_space<vmem>>, vector<2x4xf32>
      %cst_124 = arith.constant 0.000000e+00 : f32
      %295 = vector.broadcast %cst_124 : f32 to vector<2x4xf32>
      %296 = arith.maximumf %292, %295 : vector<2x4xf32>
      %297 = arith.mulf %292, %294 : vector<2x4xf32>
      %298 = arith.subf %296, %297 : vector<2x4xf32>
      %299 = math.absf %292 : vector<2x4xf32>
      %cst_125 = arith.constant 0.000000e+00 : f32
      %300 = vector.broadcast %cst_125 : f32 to vector<2x4xf32>
      %301 = arith.subf %300, %299 : vector<2x4xf32>
      %302 = math.exp %301 : vector<2x4xf32>
      %303 = math.log1p %302 : vector<2x4xf32>
      %304 = arith.addf %298, %303 : vector<2x4xf32>
      %305 = vector.shape_cast %304 : vector<2x4xf32> to vector<1x2x4xf32>
      %cst_126 = arith.constant dense<0.000000e+00> : vector<1xf32>
      %306 = vector.multi_reduction <add>, %305, %cst_126 [1, 2] : vector<1x2x4xf32> to vector<1xf32>
      %307 = vector.shape_cast %306 : vector<1xf32> to vector<1x1x1xf32>
      %308 = vector.extract %307[0, 0, 0] : f32 from vector<1x1x1xf32>
      %309 = vector.broadcast %308 : f32 to vector<1x1xf32>
      %cst_127 = arith.constant 8.000000e+00 : f32
      %310 = vector.broadcast %cst_127 : f32 to vector<1x1xf32>
      %311 = arith.divf %309, %310 : vector<1x1xf32>
      %c0_128 = arith.constant 0 : index
      %c0_129 = arith.constant 0 : index
      %312 = vector.load %arg23[%c0_128, %c0_129] : memref<1x1xf32, #tpu.memory_space<vmem>>, vector<1x1xf32>
      tpu.vector_store %arg23[%c0_128, %c0_129], %311 {strides = array<i32>} : memref<1x1xf32, #tpu.memory_space<vmem>>, vector<1x1xf32>,
    } else {
    }
    return
  }
  func.func @transform_0(%arg0: i32) -> (i32, i32) {
    %c0_i32 = arith.constant 0 : i32
    %c0_i32_0 = arith.constant 0 : i32
    %c0_i32_1 = arith.constant 0 : i32
    return %c0_i32, %c0_i32_0 : i32, i32
  }
  func.func @transform_1(%arg0: i32) -> (i32, i32) {
    %c0_i32 = arith.constant 0 : i32
    %c0_i32_0 = arith.constant 0 : i32
    %c0_i32_1 = arith.constant 0 : i32
    return %c0_i32, %c0_i32_0 : i32, i32
  }
  func.func @transform_2(%arg0: i32) -> (i32, i32) {
    %c0_i32 = arith.constant 0 : i32
    %c0_i32_0 = arith.constant 0 : i32
    %c0_i32_1 = arith.constant 0 : i32
    return %c0_i32, %c0_i32_0 : i32, i32
  }
  func.func @transform_3(%arg0: i32) -> (i32, i32) {
    %c0_i32 = arith.constant 0 : i32
    %c0_i32_0 = arith.constant 0 : i32
    %c0_i32_1 = arith.constant 0 : i32
    return %c0_i32, %c0_i32_0 : i32, i32
  }
  func.func @transform_4(%arg0: i32) -> (i32, i32, i32) {
    %c0_i32 = arith.constant 0 : i32
    %c0_i32_0 = arith.constant 0 : i32
    %c0_i32_1 = arith.constant 0 : i32
    return %arg0, %c0_i32, %c0_i32_0 : i32, i32, i32
  }
  func.func @transform_5(%arg0: i32) -> (i32, i32, i32) {
    %c0_i32 = arith.constant 0 : i32
    %c0_i32_0 = arith.constant 0 : i32
    %c0_i32_1 = arith.constant 0 : i32
    return %arg0, %c0_i32, %c0_i32_0 : i32, i32, i32
  }
  func.func @transform_6(%arg0: i32) -> (i32, i32, i32) {
    %c0_i32 = arith.constant 0 : i32
    %c0_i32_0 = arith.constant 0 : i32
    %c0_i32_1 = arith.constant 0 : i32
    return %arg0, %c0_i32, %c0_i32_0 : i32, i32, i32
  }
  func.func @transform_7(%arg0: i32) -> (i32, i32, i32) {
    %c0_i32 = arith.constant 0 : i32
    %c0_i32_0 = arith.constant 0 : i32
    %c0_i32_1 = arith.constant 0 : i32
    return %arg0, %c0_i32, %c0_i32_0 : i32, i32, i32
  }
  func.func @transform_8(%arg0: i32) -> (i32, i32, i32) {
    %c0_i32 = arith.constant 0 : i32
    %c0_i32_0 = arith.constant 0 : i32
    %c0_i32_1 = arith.constant 0 : i32
    return %arg0, %c0_i32, %c0_i32_0 : i32, i32, i32
  }
  func.func @transform_9(%arg0: i32) -> (i32, i32, i32) {
    %c0_i32 = arith.constant 0 : i32
    %c0_i32_0 = arith.constant 0 : i32
    %c0_i32_1 = arith.constant 0 : i32
    return %arg0, %c0_i32, %c0_i32_0 : i32, i32, i32
  }
  func.func @transform_10(%arg0: i32) -> (i32, i32, i32) {
    %c0_i32 = arith.constant 0 : i32
    %c0_i32_0 = arith.constant 0 : i32
    %c0_i32_1 = arith.constant 0 : i32
    return %arg0, %c0_i32, %c0_i32_0 : i32, i32, i32
  }
  func.func @transform_11(%arg0: i32) -> (i32, i32, i32) {
    %c0_i32 = arith.constant 0 : i32
    %c0_i32_0 = arith.constant 0 : i32
    %c0_i32_1 = arith.constant 0 : i32
    return %arg0, %c0_i32, %c0_i32_0 : i32, i32, i32
  }
  func.func @transform_12(%arg0: i32) -> (i32, i32, i32) {
    %c0_i32 = arith.constant 0 : i32
    %c0_i32_0 = arith.constant 0 : i32
    %c0_i32_1 = arith.constant 0 : i32
    return %arg0, %c0_i32, %c0_i32_0 : i32, i32, i32
  }
  func.func @transform_13(%arg0: i32) -> (i32, i32, i32) {
    %c0_i32 = arith.constant 0 : i32
    %c0_i32_0 = arith.constant 0 : i32
    %c0_i32_1 = arith.constant 0 : i32
    return %arg0, %c0_i32, %c0_i32_0 : i32, i32, i32
  }
  func.func @transform_14(%arg0: i32) -> (i32, i32, i32) {
    %c0_i32 = arith.constant 0 : i32
    %c0_i32_0 = arith.constant 0 : i32
    %c0_i32_1 = arith.constant 0 : i32
    return %arg0, %c0_i32, %c0_i32_0 : i32, i32, i32
  }
  func.func @transform_15(%arg0: i32) -> (i32, i32, i32) {
    %c0_i32 = arith.constant 0 : i32
    %c0_i32_0 = arith.constant 0 : i32
    %c0_i32_1 = arith.constant 0 : i32
    return %arg0, %c0_i32, %c0_i32_0 : i32, i32, i32
  }
  func.func @transform_16(%arg0: i32) -> (i32, i32) {
    %c0_i32 = arith.constant 0 : i32
    %c0_i32_0 = arith.constant 0 : i32
    %c0_i32_1 = arith.constant 0 : i32
    return %c0_i32, %c0_i32_0 : i32, i32
  }
  func.func @transform_17(%arg0: i32) -> (i32, i32) {
    %c0_i32 = arith.constant 0 : i32
    %c0_i32_0 = arith.constant 0 : i32
    %c0_i32_1 = arith.constant 0 : i32
    return %c0_i32, %c0_i32_0 : i32, i32
  }
  func.func @transform_18(%arg0: i32) -> (i32, i32) {
    %c0_i32 = arith.constant 0 : i32
    %c0_i32_0 = arith.constant 0 : i32
    %c0_i32_1 = arith.constant 0 : i32
    return %c0_i32, %c0_i32_0 : i32, i32
  }
  func.func @transform_19(%arg0: i32) -> (i32, i32) {
    %c0_i32 = arith.constant 0 : i32
    %c0_i32_0 = arith.constant 0 : i32
    %c0_i32_1 = arith.constant 0 : i32
    return %c0_i32, %c0_i32_0 : i32, i32
  }
  func.func @transform_20(%arg0: i32) -> (i32, i32) {
    %c0_i32 = arith.constant 0 : i32
    %c0_i32_0 = arith.constant 0 : i32
    %c0_i32_1 = arith.constant 0 : i32
    return %c0_i32, %c0_i32_0 : i32, i32
  }
  func.func @transform_21(%arg0: i32) -> (i32, i32) {
    %c0_i32 = arith.constant 0 : i32
    %c0_i32_0 = arith.constant 0 : i32
    %c0_i32_1 = arith.constant 0 : i32
    return %c0_i32, %c0_i32_0 : i32, i32
  }
  func.func @transform_22(%arg0: i32) -> (i32, i32) {
    %c0_i32 = arith.constant 0 : i32
    %c0_i32_0 = arith.constant 0 : i32
    %c0_i32_1 = arith.constant 0 : i32
    return %c0_i32, %c0_i32_0 : i32, i32
  }
}

</mosaic_0001>

<bundles_post_ra>
// kernel: tpu_custom_call.1
= control target key start
LH: loop header
LB: loop body
LE: loop exit
PB: predicated region body
PF: predicated region fallthrough
CT: control target
= control target key end

     0   :  { %s4939_s0 = inlined_call_operand.hbm [shape: f32[16,32], index: 0, kind: input, shape index: {}]   ;;  %s4940_s1 = inlined_call_operand.vmem [shape: f32[2,8], index: 1, kind: input, shape index: {}]   ;;  %s4941_s2 = inlined_call_operand.hbm [shape: f32[1,32], index: 2, kind: input, shape index: {}]   ;;  %s4942_s3 = inlined_call_operand.hbm [shape: f32[1,32], index: 3, kind: input, shape index: {}]   ;;  %s4943_s4 = inlined_call_operand.vmem [shape: f32[2,32,96], index: 4, kind: input, shape index: {}]   ;;  %s4944_s5 = inlined_call_operand.vmem [shape: f32[2,1,96], index: 5, kind: input, shape index: {}]   ;;  %s4945_s6 = inlined_call_operand.vmem [shape: f32[2,32,32], index: 6, kind: input, shape index: {}]   ;;  %s4946_s7 = inlined_call_operand.vmem [shape: f32[2,1,32], index: 7, kind: input, shape index: {}]   ;;  %s4947_s8 = inlined_call_operand.vmem [shape: f32[2,1,32], index: 8, kind: input, shape index: {}]   ;;  %s4948_s9 = inlined_call_operand.vmem [shape: f32[2,1,32], index: 9, kind: input, shape index: {}]   ;;  %s4949_s10 = inlined_call_operand.vmem [shape: f32[2,32,64], index: 10, kind: input, shape index: {}]   ;;  %s4950_s11 = inlined_call_operand.vmem [shape: f32[2,1,64], index: 11, kind: input, shape index: {}]   ;;  %s4951_s12 = inlined_call_operand.vmem [shape: f32[2,64,32], index: 12, kind: input, shape index: {}]   ;;  %s4952_s13 = inlined_call_operand.vmem [shape: f32[2,1,32], index: 13, kind: input, shape index: {}]   ;;  %s4953_s14 = inlined_call_operand.vmem [shape: f32[2,1,32], index: 14, kind: input, shape index: {}]   ;;  %s4954_s15 = inlined_call_operand.vmem [shape: f32[2,1,32], index: 15, kind: input, shape index: {}]   ;;  %s4955_s16 = inlined_call_operand.vmem [shape: f32[32,32], index: 16, kind: input, shape index: {}]   ;;  %s4956_s17 = inlined_call_operand.vmem [shape: f32[1,32], index: 17, kind: input, shape index: {}]   ;;  %s4957_s18 = inlined_call_operand.vmem [shape: f32[32,4], index: 18, kind: input, shape index: {}]   ;;  %s4958_s19 = inlined_call_operand.vmem [shape: f32[1,4], index: 19, kind: input, shape index: {}]   ;;  %s4959_s20 = inlined_call_operand.vmem [shape: f32[2,4], index: 20, kind: input, shape index: {}]   ;;  %s4960_s21 = inlined_call_operand.hbm [shape: f32[2,4], index: 21, kind: output, shape index: {0}]   ;;  %s4961_s22 = inlined_call_operand.hbm [shape: f32[1,1], index: 22, kind: output, shape index: {1}]  }
   0x1   :  { %4967 = sst [smem:[#allocation17_spill]] %s4939_s0 }
   0x2   :  { %4968 = sst [smem:[#allocation18_spill]] %s4940_s1 }
   0x3   :  { %4969 = sst [smem:[#allocation19_spill]] %s4941_s2 }
   0x4   :  { %4970 = sst [smem:[#allocation20_spill]] %s4942_s3 }
   0x5   :  { %4971 = sst [smem:[#allocation21_spill]] %s4943_s4 }
   0x6   :  { %4972 = sst [smem:[#allocation22_spill]] %s4944_s5 }
   0x7   :  { %4973 = sst [smem:[#allocation23_spill]] %s4945_s6 }
   0x8   :  { %4974 = sst [smem:[#allocation24_spill]] %s4956_s17 }
   0x9   :  { %4975 = sst [smem:[#allocation25_spill]] %s4957_s18 }
   0xa   :  { %4976 = sst [smem:[#allocation26_spill]] %s4958_s19 }
   0xb   :  { %4977 = sst [smem:[#allocation27_spill]] %s4959_s20 }
   0xc   :  { %4978 = sst [smem:[#allocation28_spill]] %s4960_s21 }
   0xd   :  { %4979 = sst [smem:[#allocation29_spill]] %s4961_s22 }
   0xe   :  { %28 = vsyncpa [#allocation4], 0 }
   0xf   :  { %29 = vsyncpa [#allocation7], 0 }
  0x10   :  { %30 = vsyncpa [#allocation5], 0 }
  0x11   :  { %31 = vsyncpa [#allocation11], 0  ;;  %s4448_s3 = smov 0  }
  0x12 LB: > { %4980 = sst [smem:[#allocation16_spill]] %s4308_s3  ;;  %s4310_s28 = smov [#allocation6]   ;;  %s4308_s3 = sphi %s4448_s3, %s37_s3  }
  0x13   : > { %s614_s29 = sshll.u32 %s4310_s28, 4  ;;  %s4454_s30 = sadd.s32 4294967295, %s4308_s3   ;;  %s615_s29 = int_to_ptr.vmem [resolvable:$true] %s614_s29 }
  0x14   : > { %p3687_p0 = scmp.ge.s32.totalorder %s4308_s3, 1  ;;  %p585_p1 = scmp.lt.s32.totalorder %s4308_s3, 3 }
  0x15   : > { %p4963_p3 = scmp.eq.s32.totalorder %s4454_s30, 0  ;;  %s4311_s0 = smov [#allocation3]  }
  0x16   : > { %p4460_p4 = pnand %p3687_p0, %p585_p1  ;;  %s597_s23 = sshll.u32 %s4311_s0, 4  ;;  %s598_s23 = int_to_ptr.vmem [resolvable:$true] %s597_s23 }
  0x17   : > { %s4312_s5 = smov [#allocation8]   ;;  %s4171_s6 = scalar_lea.vmem %s615_s29, 16 }
  0x18   : > { %s4981_s4 = scalar_select %p4460_p4, 1, 0 }
  0x19   : > { %p4055_p5 = pneg %p4460_p4  ;;  %s625_s24 = sshll.u32 %s4312_s5, 4  ;;  %s4472_s24 = int_to_ptr.vmem [resolvable:$true] %s625_s24 }
  0x1a   : > { %p4172_p8 = scmp.ne.s32.totalorder %s615_s29, %s4171_s6  ;;  %s4178_s25 = scalar_lea.vmem %s615_s29, 32 }
  0x1b   : > { %p4468_p6 = pnand %p4963_p3, %p4055_p5  ;;  %p4179_p11 = scmp.lt.s32.totalorder %s615_s29, %s615_s29 }
  0x1c   : > { %p4180_p12 = scmp.lt.s32.totalorder %s4178_s25, %s4171_s6 }
  0x1d   : > { %p4162_p7 = pneg %p4468_p6 }
  0x1e   : > { %p4181_p13 = por %p4180_p12, %p4179_p11 }
  0x1f   : > { %p4174_p9 = pnand %p4172_p8, %p4162_p7 }
  0x21   : > { %p4175_p10 = pneg %p4174_p9 }
  0x23   : > { %p4182_p0 = pnand %p4181_p13, %p4175_p10 }
  0x25   : > { %4185 = shalt.err (!%p4182_p0)
}
  0x26   : > { %s4983_s27 = sld [smem:[#allocation19_spill]]  ;;  %s4197_s28 = scalar_lea.vmem %s598_s23, 256 }
  0x27   : > { %p4198_p1 = scmp.ne.s32.totalorder %s598_s23, %s4197_s28  ;;  %p4205_p9 = scmp.lt.s32.totalorder %s598_s23, %s598_s23 }
  0x28   : > { %p4206_p2 = scmp.lt.s32.totalorder %s4197_s28, %s4197_s28 }
  0x29   : > { %p4200_p5 = pnand %p4198_p1, %p4162_p7 }
  0x2a   : > { %p4207_p3 = por %p4206_p2, %p4205_p9 }
  0x2b   : > { %p4201_p8 = pneg %p4200_p5 }
  0x2c   : > { %4061 = dma.hbm_to_vmem [thread:$0]  (!%p4468_p6), %s4983_s27, 16, %s615_s29, [#allocation7]  }
  0x2d   : > { %p4208_p4 = pnand %p4207_p3, %p4201_p8 }
  0x2f   : > { %4211 = shalt.err (!%p4208_p4)
}
  0x30   : > { %s4313_s0 = smov 128   ;;  %s4314_s5 = smov 8  }
  0x31   : > { %s4984_s25 = sld [smem:[#allocation17_spill]]  ;;  %s4223_s26 = scalar_lea.vmem %s4472_s24, 16 }
  0x32   : > { %p4224_p10 = scmp.ne.s32.totalorder %s4472_s24, %s4223_s26  ;;  %s4230_s2 = scalar_lea.vmem %s4472_s24, 32 }
  0x33   : > { %p4231_p4 = scmp.lt.s32.totalorder %s4472_s24, %s4472_s24  ;;  %p4232_p11 = scmp.lt.s32.totalorder %s4230_s2, %s4223_s26 }
  0x34   : > { %p4226_p2 = pnand %p4224_p10, %p4162_p7 }
  0x35   : > { %p4233_p12 = por %p4232_p11, %p4231_p4 }
  0x36   : > { %p4227_p3 = pneg %p4226_p2 }
  0x37   : > { %4058 = dma.hbm_to_vmem [thread:$0]  (!%p4468_p6), %s4984_s25, 256, %s598_s23, [#allocation4], %s4313_s0, %s4313_s0, %s4314_s5  }
  0x38   : > { %p4234_p13 = pnand %p4233_p12, %p4227_p3 }
  0x3a   : > { %4237 = shalt.err (!%p4234_p13)
}
  0x3b   : > { %s4985_s29 = sld [smem:[#allocation20_spill]]  ;;  %p4986_p0 = scmp.ne.s32.totalorder %s4981_s4, 0 }
  0x3c   : > { %p4987_p7 = scmp.eq.s32.totalorder (!%p4986_p0), %s4454_s30, 0 }
  0x3d   : > { %733 = sbr.rel (%p4986_p0) target bundleno = 4920 (0x1338), region = 104 }
  0x41   : > { %4064 = dma.hbm_to_vmem [thread:$0]  (!%p4468_p6), %s4985_s29, 16, %s4472_s24, [#allocation7]  }
  0x42   : > { %4291 = dma.done.wait (%p4987_p7), [#allocation4], 256   ;;  %p4988_p1 = pmov %p4987_p7 }
  0x44   : > { %4293 = vsyncadd (%p4988_p1), [#allocation4], 4294967040  ;;  %p4989_p5 = pmov %p4988_p1 }
  0x45   : > { %p4990_p8 = pmov %p4988_p1 }
  0x46   : > { %4295 = dma.done.wait (%p4989_p5), [#allocation7], 32  }
  0x47   : > { %4297 = vsyncadd (%p4990_p8), [#allocation7], 4294967264  ;;  %p837_p9 = scmp.lt.s32.totalorder %s4454_s30, 1  ;;  %s4992_s26 = sld [smem:[#allocation21_spill]] }
  0x48   : > { %s4993_s29 = sld [smem:[#allocation23_spill]]  ;;  %p4994_p6 = scmp.ne.s32.totalorder %s4454_s30, 0 }
  0x49   : > { %s4518_s23 = scalar_select %p837_p9, %s4454_s30, 1 }
  0x4b   : > { %s3766_s4 = sshll.u32 %s4518_s23, 5  ;;  %s3769_s5 = sshll.u32 %s4518_s23, 6 }
  0x4c   : > { %s4560_s20 = scalar_lea.vmem %s4951_s12, %s3769_s5  ;;  %s874_s1 = scalar_lea.vmem %s4952_s13, %s4518_s23 }
  0x4d   : > { %s4528_s2 = scalar_lea.vmem %s4992_s26, %s3766_s4  ;;  %s4550_s26 = scalar_lea.vmem %s4949_s10, %s3766_s4 }
  0x4e   : > { %s4533_s3 = scalar_lea.vmem %s4993_s29, %s3766_s4  ;;  %s866_s29 = scalar_lea.vmem %s4950_s11, %s4518_s23 }
  0x4f   : > { %s877_s6 = scalar_lea.vmem %s4953_s14, %s4518_s23  ;;  %s880_s18 = scalar_lea.vmem %s4954_s15, %s4518_s23 }
  0x50   : > { %884 = sbr.rel (%p4994_p6) target bundleno = 399 (0x18f), region = 120 }
  0x55   : > { %v885_v0 = vld [vmem:[#allocation3] sm:$0xff]  ;;  %vm889_vm0 = vcmask 261120   ;;  %v886_v1 = vld [vmem:[#allocation3 + $0x8] sm:$0xff]  ;;  %vm935_vm1 = vcmask 25600   ;;  %vm937_vm2 = vcmask 0   ;;  %v4315_v14 = vmov 0.0  }
  0x56   : > { %v890_v2 = vsel %vm889_vm0, %v885_v0, 0.0  ;;  %v893_v3 = vsel %vm889_vm0, %v886_v1, 0.0  ;;  %936 = vst.msk [vmem:[#allocation9] sm:$0x3] %vm935_vm1, %v4315_v14  ;;  %v3705_v22 = vld [vmem:[#allocation6] ss:$0 sm:$0xff] }
  0x57   : > { %891 = vadd.xlane.f32.xlu0 %v890_v2  ;;  %938 = vst.msk [vmem:[#allocation10] sm:$0x1] %vm937_vm2, %v4315_v14  ;;  %v3706_v24 = vld [vmem:[#allocation8] ss:$0 sm:$0xff] }
  0x5b   : > { %894 = vadd.xlane.f32.xlu0 %v893_v3 }
  0xe0   : > { %v892_v4 = vpop.xlane.xlu0 %891 }
  0xe1   : > { %v897_v5 = vmul.f32 0.03125, %v892_v4 }
  0xe3   : > { %v899_v6 = vsub.f32 %v885_v0, %v897_v5 }
  0xe4   : > { %v895_v7 = vpop.xlane.xlu0 %894 }
  0xe5   : > { %v898_v8 = vmul.f32 0.03125, %v895_v7  ;;  %v901_v9 = vmul.f32 %v899_v6, %v899_v6 }
  0xe7   : > { %v900_v10 = vsub.f32 %v886_v1, %v898_v8  ;;  %v903_v11 = vsel %vm889_vm0, %v901_v9, 0.0 }
  0xe8   : > { %904 = vadd.xlane.f32.xlu1 %v903_v11 }
  0xe9   : > { %v902_v12 = vmul.f32 %v900_v10, %v900_v10 }
  0xeb   : > { %v906_v13 = vsel %vm889_vm0, %v902_v12, 0.0 }
  0xec   : > { %907 = vadd.xlane.f32.xlu1 %v906_v13 }
 0x171   : > { %v905_v15 = vpop.xlane.xlu1 %904 }
 0x172   : > { %v909_v16 = vmul.f32 0.03125, %v905_v15 }
 0x174   : > { %v911_v17 = vadd.f32 1e-12, %v909_v16 }
 0x175   : > { %v908_v18 = vpop.xlane.xlu1 %907 }
 0x176   : > { %4106 = vrsqrt.f32 %v911_v17  ;;  %v910_v19 = vmul.f32 0.03125, %v908_v18 }
 0x178   : > { %v912_v20 = vadd.f32 1e-12, %v910_v19 }
 0x17a   : > { %4108 = vrsqrt.f32 %v912_v20 }
 0x183   : > { %v4107_v21 = vpop.eup %4106 }
 0x184   : > { %v915_v23 = vmul.f32 %v4107_v21, %v899_v6 }
 0x186   : > { %v923_v25 = vmul.f32 %v3705_v22, %v915_v23 }
 0x187   : > { %v4109_v26 = vpop.eup %4108 }
 0x188   : > { %v931_v27 = vadd.f32 %v3706_v24, %v923_v25  ;;  %v916_v28 = vmul.f32 %v4109_v26, %v900_v10 }
 0x18a   : > { %933 = vst.msk [vmem:[#allocation2] sm:$0xff] %vm889_vm0, %v931_v27  ;;  %v924_v29 = vmul.f32 %v3705_v22, %v916_v28 }
 0x18c   : > { %v932_v30 = vadd.f32 %v3706_v24, %v924_v29 }
 0x18e   : > { %934 = vst.msk [vmem:[#allocation2 + $0x8] sm:$0xff] %vm889_vm0, %v932_v30 }
 0x18f PF: > { %v944_v31 = vld [vmem:[%s4528_s2 + $0x18] sm:$0xff]  ;;  %v943_v32 = vld [vmem:[%s4528_s2 + $0x10] sm:$0xff]  ;;  %vm952_vm3 = vcmask 261120   ;;  %v942_v34 = vld [vmem:[%s4528_s2 + $0x8] sm:$0xff]  ;;  %v4316_v37 = vmov 0.0   ;;  %vm4317_vm4 = vmmov 0  }
 0x190   : > { %3850 = vmatprep.subr.mxu0 %v944_v31  ;;  %v941_v35 = vld [vmem:[%s4528_s2] sm:$0xff]  ;;  %3866 = vmatprep.subr.mxu1 %v4316_v37  ;;  %s4995_s0 = sld [smem:[#allocation22_spill]]  ;;  %s4318_s28 = smov 120   ;;  %vm1046_vm5 = vcmask 64512   ;;  %v4627_v46 = vld [vmem:[%s4533_s3 + $0x8] sm:$0xff]  ;;  %v4678_v19 = vld [vmem:[%s4533_s3 + $0x10] sm:$0xff] }
 0x191   : > { %v4584_v33 = vld [vmem:[#allocation2] sm:$0xff]  ;;  %3851 = vmatpush3.msra.mxu0 %v944_v31  ;;  %3868 = vmatprep.mubr.msk.f32.mxu1 %vm4317_vm4, %v4316_v37  ;;  %s4319_s21 = smov 96   ;;  %s4320_s22 = smov 64   ;;  %vm3136_vm6 = vcmask 523264  }
 0x192   : > { %3858 = vmatprep.mubr.msk.f32.mxu0 %vm952_vm3, %v4584_v33  ;;  %3852 = vmatprep.subr.mxu0 %v943_v32  ;;  %v4597_v38 = vld [vmem:[%s4533_s3] sm:$0xff]  ;;  %s4321_s17 = smov 88   ;;  %s4322_s19 = smov 56  }
 0x193   : > { %3853 = vmatpush3.msra.mxu0 %v943_v32  ;;  %3867 = vmatpush3.msra.mxu1 %v4597_v38  ;;  %s4997_s25 = sld [smem:[#allocation18_spill]]  ;;  %s4323_s5 = smov 112  }
 0x194   : > { %3854 = vmatprep.subr.mxu0 %v942_v34  ;;  %3876 = vmatprep.subr.mxu1 %v4316_v37  ;;  %s4324_s2 = smov 72   ;;  %s4327_s24 = smov 48  }
 0x195   : > { %3855 = vmatpush3.msra.mxu0 %v942_v34  ;;  %v4590_v36 = vld [vmem:[#allocation2 + $0x8] sm:$0xff]  ;;  %s4328_s4 = smov 40   ;;  %p3755_p10 = scmp.ne.s32.totalorder %s4454_s30, 1 }
 0x196   : > { %3856 = vmatprep.subr.mxu0 %v941_v35  ;;  %s4996_s27 = scalar_lea.vmem %s4995_s0, %s4518_s23  ;;  %s4325_s0 = smov 104  }
 0x197   : > { %3857 = vmatpush3.msra.mxu0 %v941_v35  ;;  %v3707_v39 = vld [vmem:[%s4996_s27] ss:$0 sm:$0xff]  ;;  %s4326_s27 = smov 80  }
 0x198   : > { %3859 = vmatmul.mubr.msk.f32.vlgmr.msra.gmra.mxu0 %vm952_vm3, %v4590_v36  ;;  %3861 = vmatprep.subr.mxu0 %v4316_v37 }
 0x199   : > { %3863 = vmatprep.mubr.msk.f32.mxu0 %vm4317_vm4, %v4316_v37  ;;  %v4650_v58 = vld [vmem:[%s4997_s25] ss:$0 sm:$0xff] }
 0x258   : > { %v3860_v40 = vpop.f32.mrf.mxu0 }
 0x259   : > { %v4610_v41 = vadd.f32 %v3860_v40, %v3707_v39 }
 0x25a   : > { %v1025_v42 = vpop.f32.mrf.mxu0 }
 0x25b   : > { %v4612_v43 = vadd.f32 %v3707_v39, %v1025_v42 }
 0x25d   : > { %1208 = vrot.lane.b32.xlu1 %v4612_v43, %s4318_s28  ;;  %1044 = vrot.lane.b32.xlu0 %v4612_v43, %s4319_s21 }
 0x261   : > { %1134 = vrot.lane.b32.xlu1 %v4612_v43, %s4320_s22  ;;  %1210 = vrot.lane.b32.xlu0 %v4612_v43, %s4321_s17 }
 0x265   : > { %1299 = vrot.lane.b32.xlu0 %v4612_v43, %s4322_s19 }
 0x2cf   : > { %v1209_v44 = vpop.permute.xlu1 %1208  ;;  %v1045_v45 = vpop.permute.xlu0 %1044 }
 0x2d0   : > { %3862 = vmatpush3.xpose.msk.msra.mxu0 %vm1046_vm5, %v1045_v45 }
 0x2d1   : > { %3871 = vmatprep.subr.mxu0 %v4316_v37 }
 0x2d3   : > { %v1135_v47 = vpop.permute.xlu1 %1134  ;;  %3864 = vmatmul.mubr.msk.f32.vlgmr.msra.gmra.mxu0 %vm1046_vm5, %v4612_v43  ;;  %v1211_v48 = vpop.permute.xlu0 %1210 }
 0x2d4   : > { %3869 = vmatmul.mubr.msk.f32.vlgmr.msra.gmra.mxu1 %vm1046_vm5, %v1135_v47  ;;  %3872 = vmatpush3.xpose.msk.msra.mxu0 %vm1046_vm5, %v1211_v48 }
 0x2d5   : > { %3873 = vmatprep.mubr.msk.f32.mxu0 %vm4317_vm4, %v4316_v37  ;;  %3877 = vmatpush3.msra.mxu1 %v4627_v46 }
 0x2d6   : > { %3878 = vmatprep.mubr.msk.f32.mxu1 %vm4317_vm4, %v4316_v37  ;;  %3886 = vmatprep.subr.mxu1 %v4316_v37 }
 0x2d7   : > { %3874 = vmatmul.mubr.msk.f32.vlgmr.msra.gmra.mxu0 %vm1046_vm5, %v1209_v44  ;;  %v1300_v49 = vpop.permute.xlu0 %1299  ;;  %3881 = vmatprep.subr.mxu0 %v4316_v37 }
 0x2d8   : > { %3879 = vmatmul.mubr.msk.f32.vlgmr.msra.gmra.mxu1 %vm1046_vm5, %v1300_v49  ;;  %3883 = vmatprep.mubr.msk.f32.mxu0 %vm4317_vm4, %v4316_v37 }
 0x2d9   : > { %3888 = vmatprep.mubr.msk.f32.mxu1 %vm4317_vm4, %v4316_v37 }
 0x393   : > { %v1117_v50 = vpop.f32.mrf.mxu0 }
 0x394   : > { %v1204_v51 = vpop.f32.mrf.mxu1  ;;  %v1121_v62 = vmul.f32 0.35355338, %v1117_v50 }
 0x395   : > { %v3865_v52 = vpop.f32.mrf.mxu0  ;;  %3887 = vmatpush3.msra.mxu1 %v1204_v51 }
 0x396   : > { %v3870_v53 = vpop.f32.mrf.mxu1  ;;  %3896 = vmatprep.subr.mxu1 %v4316_v37  ;;  %v1122_v63 = vadd.f32 %v4650_v58, %v1121_v62 }
 0x397   : > { %v1282_v54 = vpop.f32.mrf.mxu0 }
 0x398   : > { %v1286_v55 = vmul.f32 0.35355338, %v1282_v54  ;;  %v1369_v56 = vpop.f32.mrf.mxu1  ;;  %v1123_v0 = vsel %vm1046_vm5, %v1122_v63, -inf }
 0x399   : > { %v3875_v57 = vpop.f32.mrf.mxu0  ;;  %3882 = vmatpush3.msra.mxu0 %v1369_v56 }
 0x39a   : > { %v3880_v59 = vpop.f32.mrf.mxu1  ;;  %v1287_v60 = vadd.f32 %v4650_v58, %v1286_v55  ;;  %3891 = vmatprep.subr.mxu0 %v4316_v37 }
 0x39c   : > { %v1288_v61 = vsel %vm1046_vm5, %v1287_v60, -inf }
 0x39d   : > { %1289 = vmax.xlane.f32.xlu1 %v1288_v61  ;;  %v4713_v61 = vld [vmem:[%s4533_s3 + $0x18] sm:$0xff] }
 0x3ae   : > { %1519 = vrot.lane.b32.xlu1 %v4612_v43, %s4323_s5 }
 0x3d2   : > { %1124 = vmax.xlane.f32.xlu1 %v1123_v0 }
 0x3e3   : > { %1760 = vrot.lane.b32.xlu1 %v4612_v43, %s4324_s2 }
 0x3e7   : > { %1758 = vrot.lane.b32.xlu1 %v4612_v43, %s4325_s0 }
 0x426   : > { %v1290_v1 = vpop.xlane.xlu1 %1289 }
 0x427   : > { %v1291_v2 = vsub.f32 %v1287_v60, %v1290_v1 }
 0x429   : > { %v1292_v3 = vmul.f32 1.442695, %v1291_v2 }
 0x42a   : > { %v1520_v6 = vpop.permute.xlu1 %1519 }
 0x42b   : > { %4110 = vpow2.f32 %v1292_v3 }
 0x438   : > { %v4111_v4 = vpop.eup %4110 }
 0x439   : > { %v1294_v5 = vsel %vm1046_vm5, %v4111_v4, 0.0 }
 0x43a   : > { %1295 = vadd.xlane.f32.xlu0 %v1294_v5 }
 0x450   : > { %1521 = vrot.lane.b32.xlu0 %v4612_v43, %s4326_s27 }
 0x45b   : > { %v1125_v7 = vpop.xlane.xlu1 %1124 }
 0x45c   : > { %v1126_v8 = vsub.f32 %v1122_v63, %v1125_v7 }
 0x45e   : > { %v1127_v9 = vmul.f32 1.442695, %v1126_v8 }
 0x45f   : > { %v1761_v20 = vpop.permute.xlu1 %1760 }
 0x460   : > { %4112 = vpow2.f32 %v1127_v9 }
 0x463   : > { %v1759_v22 = vpop.permute.xlu1 %1758 }
 0x46d   : > { %v4113_v10 = vpop.eup %4112 }
 0x46e   : > { %v1129_v11 = vsel %vm1046_vm5, %v4113_v10, 0.0 }
 0x46f   : > { %1130 = vadd.xlane.f32.xlu0 %v1129_v11 }
 0x485   : > { %1610 = vrot.lane.b32.xlu0 %v4612_v43, %s4327_s24 }
 0x4c3   : > { %v1296_v12 = vpop.xlane.xlu0 %1295 }
 0x4c4   : > { %4114 = vrcp.f32 %v1296_v12 }
 0x4c7   : > { %v1522_v15 = vpop.permute.xlu0 %1521 }
 0x4d1   : > { %v4115_v13 = vpop.eup %4114 }
 0x4d2   : > { %v1298_v14 = vmul.f32 %v4115_v13, %v4111_v4 }
 0x4d4   : > { %3884 = vmatmul.mubr.msk.f32.vlgmr.msra.gmra.mxu0 %vm1046_vm5, %v1298_v14  ;;  %v4749_v14 = vld [vmem:[%s4997_s25 + $0x1] ss:$0 sm:$0xff] }
 0x4d5   : > { %3892 = vmatpush3.xpose.msk.msra.mxu0 %vm1046_vm5, %v1522_v15  ;;  %3893 = vmatprep.mubr.msk.f32.mxu0 %vm4317_vm4, %v4316_v37 }
 0x4d6   : > { %3901 = vmatprep.subr.mxu0 %v4316_v37 }
 0x4d8   : > { %3894 = vmatmul.mubr.msk.f32.vlgmr.msra.gmra.mxu0 %vm1046_vm5, %v1520_v6 }
 0x4d9   : > { %3903 = vmatprep.mubr.msk.f32.mxu0 %vm4317_vm4, %v4316_v37 }
 0x4f8   : > { %v1131_v16 = vpop.xlane.xlu0 %1130 }
 0x4f9   : > { %4116 = vrcp.f32 %v1131_v16 }
 0x4fc   : > { %v1611_v21 = vpop.permute.xlu0 %1610 }
 0x506   : > { %v4117_v17 = vpop.eup %4116 }
 0x507   : > { %v1133_v18 = vmul.f32 %v4117_v17, %v4113_v10 }
 0x509   : > { %3889 = vmatmul.mubr.msk.f32.vlgmr.msra.gmra.mxu1 %vm1046_vm5, %v1133_v18 }
 0x50a   : > { %3897 = vmatpush3.msra.mxu1 %v4678_v19  ;;  %3898 = vmatprep.mubr.msk.f32.mxu1 %vm4317_vm4, %v4316_v37 }
 0x50b   : > { %3906 = vmatprep.subr.mxu1 %v4316_v37 }
 0x50d   : > { %3899 = vmatmul.mubr.msk.f32.vlgmr.msra.gmra.mxu1 %vm1046_vm5, %v1611_v21 }
 0x50e   : > { %3907 = vmatpush3.xpose.msk.msra.mxu1 %vm1046_vm5, %v1761_v20  ;;  %3908 = vmatprep.mubr.msk.f32.mxu1 %vm4317_vm4, %v4316_v37 }
 0x50f   : > { %3916 = vmatprep.subr.mxu1 %v4316_v37 }
 0x511   : > { %3909 = vmatmul.mubr.msk.f32.vlgmr.msra.gmra.mxu1 %vm1046_vm5, %v1759_v22 }
 0x512   : > { %3918 = vmatprep.mubr.msk.f32.mxu1 %vm4317_vm4, %v4316_v37 }
 0x594   : > { %v1442_v23 = vpop.f32.mrf.mxu0 }
 0x596   : > { %v3885_v24 = vpop.f32.mrf.mxu0 }
 0x598   : > { %v1593_v25 = vpop.f32.mrf.mxu0 }
 0x599   : > { %v1597_v26 = vmul.f32 0.35355338, %v1593_v25 }
 0x59a   : > { %v3895_v27 = vpop.f32.mrf.mxu0 }
 0x59b   : > { %v1598_v28 = vadd.f32 %v4650_v58, %v1597_v26 }
 0x59d   : > { %v1599_v29 = vsel %vm1046_vm5, %v1598_v28, -inf }
 0x59e   : > { %1600 = vmax.xlane.f32.xlu0 %v1599_v29 }
 0x5b4   : > { %1849 = vrot.lane.b32.xlu0 %v4612_v43, %s4328_s4 }
 0x5b8   : > { %2168 = vrot.lane.b32.xlu0 %v4610_v41, %s4321_s17  ;;  %s4998_s17 = scalar_lea.vmem %s4946_s7, %s4518_s23 }
 0x5c9   : > { %v1515_v30 = vpop.f32.mrf.mxu1 }
 0x5ca   : > { %v1516_v31 = vadd.f32 %v1515_v30, %v1442_v23 }
 0x5cb   : > { %v3890_v32 = vpop.f32.mrf.mxu1 }
 0x5cd   : > { %v1680_v34 = vpop.f32.mrf.mxu1 }
 0x5ce   : > { %3902 = vmatpush3.msra.mxu0 %v1680_v34 }
 0x5cf   : > { %v3900_v35 = vpop.f32.mrf.mxu1  ;;  %3911 = vmatprep.subr.mxu0 %v4316_v37 }
 0x5d1   : > { %v1832_v39 = vpop.f32.mrf.mxu1 }
 0x5d2   : > { %v1836_v40 = vmul.f32 0.35355338, %v1832_v39 }
 0x5d3   : > { %v3910_v42 = vpop.f32.mrf.mxu1 }
 0x5d4   : > { %v1837_v44 = vadd.f32 %v4650_v58, %v1836_v40 }
 0x5d6   : > { %v1838_v45 = vsel %vm1046_vm5, %v1837_v44, -inf }
 0x5d7   : > { %1839 = vmax.xlane.f32.xlu0 %v1838_v45 }
 0x5ed   : > { %2092 = vrot.lane.b32.xlu0 %v4610_v41, %s4320_s22 }
 0x627   : > { %v1601_v43 = vpop.xlane.xlu0 %1600 }
 0x628   : > { %v1602_v47 = vsub.f32 %v1598_v28, %v1601_v43 }
 0x62a   : > { %v1603_v48 = vmul.f32 1.442695, %v1602_v47 }
 0x62b   : > { %v1850_v51 = vpop.permute.xlu0 %1849 }
 0x62c   : > { %4118 = vpow2.f32 %v1603_v48 }
 0x62f   : > { %v2169_v52 = vpop.permute.xlu0 %2168 }
 0x639   : > { %v4119_v49 = vpop.eup %4118 }
 0x63a   : > { %v1605_v50 = vsel %vm1046_vm5, %v4119_v49, 0.0 }
 0x63b   : > { %1606 = vadd.xlane.f32.xlu1 %v1605_v50 }
 0x64c   : > { %2003 = vrot.lane.b32.xlu1 %v4610_v41, %s4319_s21 }
 0x650   : > { %2166 = vrot.lane.b32.xlu1 %v4610_v41, %s4318_s28 }
 0x660   : > { %v1840_v53 = vpop.xlane.xlu0 %1839 }
 0x661   : > { %v1841_v54 = vsub.f32 %v1837_v44, %v1840_v53 }
 0x663   : > { %v1842_v55 = vmul.f32 1.442695, %v1841_v54 }
 0x664   : > { %v2093_v9 = vpop.permute.xlu0 %2092 }
 0x665   : > { %4120 = vpow2.f32 %v1842_v55 }
 0x672   : > { %v4121_v56 = vpop.eup %4120 }
 0x673   : > { %v1844_v57 = vsel %vm1046_vm5, %v4121_v56, 0.0 }
 0x674   : > { %1845 = vadd.xlane.f32.xlu1 %v1844_v57 }
 0x685   : > { %2257 = vrot.lane.b32.xlu1 %v4610_v41, %s4322_s19 }
 0x6c4   : > { %v1607_v58 = vpop.xlane.xlu1 %1606 }
 0x6c5   : > { %4122 = vrcp.f32 %v1607_v58 }
 0x6c8   : > { %v2004_v62 = vpop.permute.xlu1 %2003 }
 0x6cc   : > { %v2167_v63 = vpop.permute.xlu1 %2166 }
 0x6d2   : > { %v4123_v59 = vpop.eup %4122 }
 0x6d3   : > { %v1609_v60 = vmul.f32 %v4123_v59, %v4119_v49 }
 0x6d5   : > { %3904 = vmatmul.mubr.msk.f32.vlgmr.msra.gmra.mxu0 %vm1046_vm5, %v1609_v60 }
 0x6d6   : > { %3912 = vmatpush3.msra.mxu0 %v4713_v61  ;;  %3913 = vmatprep.mubr.msk.f32.mxu0 %vm4317_vm4, %v4316_v37 }
 0x6d7   : > { %3921 = vmatprep.subr.mxu0 %v4316_v37 }
 0x6d9   : > { %3914 = vmatmul.mubr.msk.f32.vlgmr.msra.gmra.mxu0 %vm1046_vm5, %v1850_v51 }
 0x6da   : > { %3922 = vmatpush3.xpose.msk.msra.mxu0 %vm1046_vm5, %v2004_v62  ;;  %3923 = vmatprep.mubr.msk.f32.mxu0 %vm4317_vm4, %v4316_v37 }
 0x6db   : > { %3931 = vmatprep.subr.mxu0 %v4316_v37 }
 0x6dd   : > { %3924 = vmatmul.mubr.msk.f32.vlgmr.msra.gmra.mxu0 %vm1046_vm5, %v4610_v41 }
 0x6de   : > { %3932 = vmatpush3.xpose.msk.msra.mxu0 %vm1046_vm5, %v2169_v52  ;;  %3933 = vmatprep.mubr.msk.f32.mxu0 %vm4317_vm4, %v4316_v37 }
 0x6df   : > { %3941 = vmatprep.subr.mxu0 %v4316_v37 }
 0x6e1   : > { %3934 = vmatmul.mubr.msk.f32.vlgmr.msra.gmra.mxu0 %vm1046_vm5, %v2167_v63 }
 0x6e2   : > { %3943 = vmatprep.mubr.msk.f32.mxu0 %vm4317_vm4, %v4316_v37 }
 0x6fd   : > { %v1846_v0 = vpop.xlane.xlu1 %1845 }
 0x6fe   : > { %4124 = vrcp.f32 %v1846_v0 }
 0x701   : > { %v2258_v12 = vpop.permute.xlu1 %2257 }
 0x70b   : > { %v4125_v2 = vpop.eup %4124 }
 0x70c   : > { %v1848_v6 = vmul.f32 %v4125_v2, %v4121_v56 }
 0x795   : > { %v1753_v1 = vpop.f32.mrf.mxu0 }
 0x796   : > { %v1757_v3 = vadd.f32 %v1753_v1, %v1516_v31 }
 0x797   : > { %v3905_v4 = vpop.f32.mrf.mxu0 }
 0x799   : > { %v1919_v5 = vpop.f32.mrf.mxu0 }
 0x79a   : > { %3917 = vmatpush3.msra.mxu1 %v1919_v5 }
 0x79b   : > { %v3915_v7 = vpop.f32.mrf.mxu0  ;;  %3919 = vmatmul.mubr.msk.f32.vlgmr.msra.gmra.mxu1 %vm1046_vm5, %v1848_v6  ;;  %3926 = vmatprep.subr.mxu1 %v4316_v37 }
 0x79c   : > { %3927 = vmatpush3.msra.mxu1 %v4597_v38  ;;  %3928 = vmatprep.mubr.msk.f32.mxu1 %vm4317_vm4, %v4316_v37 }
 0x79d   : > { %v2075_v8 = vpop.f32.mrf.mxu0  ;;  %3936 = vmatprep.subr.mxu1 %v4316_v37 }
 0x79e   : > { %v2079_v16 = vmul.f32 0.35355338, %v2075_v8 }
 0x79f   : > { %v3925_v10 = vpop.f32.mrf.mxu0  ;;  %3929 = vmatmul.mubr.msk.f32.vlgmr.msra.gmra.mxu1 %vm1046_vm5, %v2093_v9 }
 0x7a0   : > { %3937 = vmatpush3.msra.mxu1 %v4627_v46  ;;  %3938 = vmatprep.mubr.msk.f32.mxu1 %vm4317_vm4, %v4316_v37  ;;  %v2080_v17 = vadd.f32 %v4749_v14, %v2079_v16 }
 0x7a1   : > { %v2240_v11 = vpop.f32.mrf.mxu0  ;;  %3946 = vmatprep.subr.mxu1 %v4316_v37 }
 0x7a2   : > { %v2244_v38 = vmul.f32 0.35355338, %v2240_v11  ;;  %v2081_v18 = vsel %vm1046_vm5, %v2080_v17, -inf }
 0x7a3   : > { %v3935_v13 = vpop.f32.mrf.mxu0  ;;  %3939 = vmatmul.mubr.msk.f32.vlgmr.msra.gmra.mxu1 %vm1046_vm5, %v2258_v12 }
 0x7a4   : > { %v2245_v15 = vadd.f32 %v4749_v14, %v2244_v38  ;;  %3948 = vmatprep.mubr.msk.f32.mxu1 %vm4317_vm4, %v4316_v37 }
 0x7a6   : > { %v2246_v46 = vsel %vm1046_vm5, %v2245_v15, -inf }
 0x7a7   : > { %2247 = vmax.xlane.f32.xlu0 %v2246_v46 }
 0x7bd   : > { %2479 = vrot.lane.b32.xlu0 %v4610_v41, %s4326_s27 }
 0x7dc   : > { %2082 = vmax.xlane.f32.xlu0 %v2081_v18 }
 0x7f2   : > { %2568 = vrot.lane.b32.xlu0 %v4610_v41, %s4327_s24  ;;  %s5000_s24 = scalar_lea.vmem %s4948_s9, %s4518_s23 }
 0x7f6   : > { %2716 = vrot.lane.b32.xlu0 %v4610_v41, %s4325_s0 }
 0x830   : > { %v2248_v20 = vpop.xlane.xlu0 %2247 }
 0x831   : > { %v2249_v21 = vsub.f32 %v2245_v15, %v2248_v20 }
 0x833   : > { %v2250_v22 = vmul.f32 1.442695, %v2249_v21 }
 0x834   : > { %v2480_v29 = vpop.permute.xlu0 %2479 }
 0x835   : > { %4126 = vpow2.f32 %v2250_v22 }
 0x842   : > { %v4127_v23 = vpop.eup %4126 }
 0x843   : > { %v2252_v24 = vsel %vm1046_vm5, %v4127_v23, 0.0 }
 0x844   : > { %2253 = vadd.xlane.f32.xlu1 %v2252_v24 }
 0x855   : > { %2477 = vrot.lane.b32.xlu1 %v4610_v41, %s4323_s5  ;;  %s5004_s5 = sld [smem:[#allocation27_spill]] (!%p3755_p10) }
 0x85b   : > { %v1992_v25 = vpop.f32.mrf.mxu1 }
 0x85c   : > { %v4766_v26 = vadd.f32 %v1992_v25, %v1757_v3 }
 0x85d   : > { %v3920_v27 = vpop.f32.mrf.mxu1 }
 0x85f   : > { %v2162_v28 = vpop.f32.mrf.mxu1 }
 0x860   : > { %3947 = vmatpush3.msra.mxu1 %v2162_v28 }
 0x861   : > { %v3930_v30 = vpop.f32.mrf.mxu1  ;;  %3956 = vmatprep.subr.mxu1 %v4316_v37 }
 0x863   : > { %v2327_v31 = vpop.f32.mrf.mxu1 }
 0x864   : > { %3942 = vmatpush3.msra.mxu0 %v2327_v31 }
 0x865   : > { %v3940_v32 = vpop.f32.mrf.mxu1  ;;  %v2083_v34 = vpop.xlane.xlu0 %2082  ;;  %3951 = vmatprep.subr.mxu0 %v4316_v37 }
 0x866   : > { %v2084_v35 = vsub.f32 %v2080_v17, %v2083_v34 }
 0x868   : > { %v2085_v39 = vmul.f32 1.442695, %v2084_v35 }
 0x869   : > { %v2569_v51 = vpop.permute.xlu0 %2568 }
 0x86a   : > { %4128 = vpow2.f32 %v2085_v39 }
 0x86d   : > { %v2717_v53 = vpop.permute.xlu0 %2716 }
 0x877   : > { %v4129_v40 = vpop.eup %4128 }
 0x878   : > { %v2087_v42 = vsel %vm1046_vm5, %v4129_v40, 0.0 }
 0x879   : > { %2088 = vadd.xlane.f32.xlu1 %v2087_v42 }
 0x88a   : > { %2718 = vrot.lane.b32.xlu1 %v4610_v41, %s4324_s2  ;;  %s4999_s2 = scalar_lea.vmem %s4947_s8, %s4518_s23  ;;  %s5003_s23 = sld [smem:[#allocation26_spill]] (!%p3755_p10) }
 0x8cd   : > { %v2254_v44 = vpop.xlane.xlu1 %2253 }
 0x8ce   : > { %4130 = vrcp.f32 %v2254_v44 }
 0x8d1   : > { %v2478_v47 = vpop.permute.xlu1 %2477 }
 0x8db   : > { %v4131_v45 = vpop.eup %4130 }
 0x8dc   : > { %v2256_v43 = vmul.f32 %v4131_v45, %v4127_v23 }
 0x8de   : > { %3944 = vmatmul.mubr.msk.f32.vlgmr.msra.gmra.mxu0 %vm1046_vm5, %v2256_v43 }
 0x8df   : > { %3952 = vmatpush3.xpose.msk.msra.mxu0 %vm1046_vm5, %v2480_v29  ;;  %3953 = vmatprep.mubr.msk.f32.mxu0 %vm4317_vm4, %v4316_v37 }
 0x8e0   : > { %3961 = vmatprep.subr.mxu0 %v4316_v37 }
 0x8e2   : > { %3954 = vmatmul.mubr.msk.f32.vlgmr.msra.gmra.mxu0 %vm1046_vm5, %v2478_v47 }
 0x8e3   : > { %3963 = vmatprep.mubr.msk.f32.mxu0 %vm4317_vm4, %v4316_v37 }
 0x902   : > { %v2089_v48 = vpop.xlane.xlu1 %2088 }
 0x903   : > { %4132 = vrcp.f32 %v2089_v48 }
 0x906   : > { %v2719_v52 = vpop.permute.xlu1 %2718 }
 0x910   : > { %v4133_v49 = vpop.eup %4132 }
 0x911   : > { %v2091_v50 = vmul.f32 %v4133_v49, %v4129_v40 }
 0x913   : > { %3949 = vmatmul.mubr.msk.f32.vlgmr.msra.gmra.mxu1 %vm1046_vm5, %v2091_v50 }
 0x914   : > { %3957 = vmatpush3.msra.mxu1 %v4678_v19  ;;  %3958 = vmatprep.mubr.msk.f32.mxu1 %vm4317_vm4, %v4316_v37 }
 0x915   : > { %3966 = vmatprep.subr.mxu1 %v4316_v37 }
 0x917   : > { %3959 = vmatmul.mubr.msk.f32.vlgmr.msra.gmra.mxu1 %vm1046_vm5, %v2569_v51 }
 0x918   : > { %3967 = vmatpush3.xpose.msk.msra.mxu1 %vm1046_vm5, %v2719_v52  ;;  %3968 = vmatprep.mubr.msk.f32.mxu1 %vm4317_vm4, %v4316_v37 }
 0x919   : > { %3976 = vmatprep.subr.mxu1 %v4316_v37 }
 0x91b   : > { %3969 = vmatmul.mubr.msk.f32.vlgmr.msra.gmra.mxu1 %vm1046_vm5, %v2717_v53  ;;  %v3745_v53 = vld [vmem:[%s4999_s2] ss:$0 sm:$0xff] }
 0x91c   : > { %3978 = vmatprep.mubr.msk.f32.mxu1 %vm4317_vm4, %v4316_v37 }
 0x99e   : > { %v2400_v19 = vpop.f32.mrf.mxu0 }
 0x9a0   : > { %v3945_v54 = vpop.f32.mrf.mxu0 }
 0x9a1   : > { %v3746_v54 = vld [vmem:[%s5000_s24] ss:$0 sm:$0xff]  ;;  %s5001_s24 = sld [smem:[#allocation25_spill]] (!%p3755_p10) }
 0x9a2   : > { %v2551_v55 = vpop.f32.mrf.mxu0 }
 0x9a3   : > { %v2555_v56 = vmul.f32 0.35355338, %v2551_v55 }
 0x9a4   : > { %v3955_v57 = vpop.f32.mrf.mxu0 }
 0x9a5   : > { %v2556_v58 = vadd.f32 %v4749_v14, %v2555_v56  ;;  %v3014_v57 = vld [vmem:[%s4550_s26 + $0x18] sm:$0xff] }
 0x9a7   : > { %v2557_v59 = vsel %vm1046_vm5, %v2556_v58, -inf }
 0x9a8   : > { %2558 = vmax.xlane.f32.xlu1 %v2557_v59  ;;  %v3012_v59 = vld [vmem:[%s4550_s26 + $0x8] sm:$0xff] }
 0x9d3   : > { %v2473_v60 = vpop.f32.mrf.mxu1 }
 0x9d4   : > { %v2474_v62 = vadd.f32 %v2473_v60, %v2400_v19  ;;  %v3011_v60 = vld [vmem:[%s4550_s26] sm:$0xff] }
 0x9d5   : > { %v3950_v63 = vpop.f32.mrf.mxu1 }
 0x9d7   : > { %v2638_v0 = vpop.f32.mrf.mxu1 }
 0x9d8   : > { %3962 = vmatpush3.msra.mxu0 %v2638_v0 }
 0x9d9   : > { %v3960_v1 = vpop.f32.mrf.mxu1  ;;  %3971 = vmatprep.subr.mxu0 %v4316_v37 }
 0x9db   : > { %v2790_v2 = vpop.f32.mrf.mxu1 }
 0x9dc   : > { %v2794_v3 = vmul.f32 0.35355338, %v2790_v2 }
 0x9dd   : > { %v3970_v4 = vpop.f32.mrf.mxu1 }
 0x9de   : > { %v2795_v5 = vadd.f32 %v4749_v14, %v2794_v3  ;;  %v3744_v14 = vld [vmem:[%s4998_s17] ss:$0 sm:$0xff] }
 0x9df   : > { %v2962_v15 = vadd.f32 %v3744_v14, %v4766_v26 }
 0x9e0   : > { %v2796_v6 = vsel %vm1046_vm5, %v2795_v5, -inf }
 0x9e1   : > { %2797 = vmax.xlane.f32.xlu1 %v2796_v6  ;;  %v2964_v17 = vadd.f32 %v2962_v15, %v4584_v33  ;;  %v3127_v6 = vld [vmem:[%s4560_s20 + $0x30] sm:$0xff] }
 0x9e3   : > { %v2968_v18 = vsel %vm952_vm3, %v2964_v17, 0.0 }
 0xa31   : > { %v2559_v7 = vpop.xlane.xlu1 %2558 }
 0xa32   : > { %v2560_v8 = vsub.f32 %v2556_v58, %v2559_v7  ;;  %v3013_v58 = vld [vmem:[%s4550_s26 + $0x10] sm:$0xff]  ;;  %v3126_v7 = vld [vmem:[%s4560_s20 + $0x28] sm:$0xff] }
 0xa34   : > { %v2561_v9 = vmul.f32 1.442695, %v2560_v8  ;;  %v3125_v8 = vld [vmem:[%s4560_s20 + $0x20] sm:$0xff] }
 0xa36   : > { %4134 = vpow2.f32 %v2561_v9  ;;  %v3124_v9 = vld [vmem:[%s4560_s20 + $0x18] sm:$0xff] }
 0xa43   : > { %v4135_v10 = vpop.eup %4134 }
 0xa44   : > { %v2563_v11 = vsel %vm1046_vm5, %v4135_v10, 0.0 }
 0xa45   : > { %2564 = vadd.xlane.f32.xlu0 %v2563_v11  ;;  %v3122_v11 = vld [vmem:[%s4560_s20 + $0x8] sm:$0xff] }
 0xa5b   : > { %2807 = vrot.lane.b32.xlu0 %v4610_v41, %s4328_s4 }
 0xa6a   : > { %v2798_v12 = vpop.xlane.xlu1 %2797 }
 0xa6b   : > { %v2799_v38 = vsub.f32 %v2795_v5, %v2798_v12  ;;  %v3128_v5 = vld [vmem:[%s4560_s20 + $0x38] sm:$0xff]  ;;  %v3121_v12 = vld [vmem:[%s4560_s20] sm:$0xff] }
 0xa6d   : > { %v2800_v13 = vmul.f32 1.442695, %v2799_v38  ;;  %v3747_v38 = vld [vmem:[%s866_s29] ss:$0 sm:$0xff] }
 0xa6f   : > { %4136 = vpow2.f32 %v2800_v13 }
 0xa7c   : > { %v4137_v46 = vpop.eup %4136 }
 0xa7d   : > { %v2802_v16 = vsel %vm1046_vm5, %v4137_v46, 0.0 }
 0xa7e   : > { %2803 = vadd.xlane.f32.xlu1 %v2802_v16 }
 0xa82   : > { %2969 = vadd.xlane.f32.xlu1 %v2968_v18 }
 0xace   : > { %v2565_v41 = vpop.xlane.xlu0 %2564 }
 0xacf   : > { %4138 = vrcp.f32 %v2565_v41 }
 0xad2   : > { %v2808_v22 = vpop.permute.xlu0 %2807 }
 0xadc   : > { %v4139_v20 = vpop.eup %4138 }
 0xadd   : > { %v2567_v21 = vmul.f32 %v4139_v20, %v4135_v10  ;;  %v3123_v10 = vld [vmem:[%s4560_s20 + $0x10] sm:$0xff] }
 0xadf   : > { %3964 = vmatmul.mubr.msk.f32.vlgmr.msra.gmra.mxu0 %vm1046_vm5, %v2567_v21 }
 0xae0   : > { %3972 = vmatpush3.msra.mxu0 %v4713_v61  ;;  %3973 = vmatprep.mubr.msk.f32.mxu0 %vm4317_vm4, %v4316_v37 }
 0xae1   : > { %3981 = vmatprep.subr.mxu0 %v3014_v57 }
 0xae3   : > { %3974 = vmatmul.mubr.msk.f32.vlgmr.msra.gmra.mxu0 %vm1046_vm5, %v2808_v22 }
 0xae4   : > { %3982 = vmatpush3.msra.mxu0 %v3014_v57 }
 0xae5   : > { %3983 = vmatprep.subr.mxu0 %v3013_v58 }
 0xae6   : > { %3984 = vmatpush3.msra.mxu0 %v3013_v58 }
 0xae7   : > { %3985 = vmatprep.subr.mxu0 %v3012_v59 }
 0xae8   : > { %3986 = vmatpush3.msra.mxu0 %v3012_v59 }
 0xae9   : > { %3987 = vmatprep.subr.mxu0 %v3011_v60 }
 0xaea   : > { %3988 = vmatpush3.msra.mxu0 %v3011_v60 }
 0xb07   : > { %v2804_v23 = vpop.xlane.xlu1 %2803 }
 0xb08   : > { %4140 = vrcp.f32 %v2804_v23 }
 0xb0b   : > { %v2970_v30 = vpop.xlane.xlu1 %2969 }
 0xb0c   : > { %v2975_v61 = vmul.f32 0.03125, %v2970_v30 }
 0xb0e   : > { %v2977_v34 = vsub.f32 %v2964_v17, %v2975_v61 }
 0xb10   : > { %v2979_v42 = vmul.f32 %v2977_v34, %v2977_v34 }
 0xb12   : > { %v2981_v44 = vsel %vm952_vm3, %v2979_v42, 0.0 }
 0xb15   : > { %v4141_v24 = vpop.eup %4140 }
 0xb16   : > { %v2806_v28 = vmul.f32 %v4141_v24, %v4137_v46 }
 0xb9f   : > { %v2711_v33 = vpop.f32.mrf.mxu0 }
 0xba0   : > { %v2715_v25 = vadd.f32 %v2711_v33, %v2474_v62 }
 0xba1   : > { %v3965_v26 = vpop.f32.mrf.mxu0 }
 0xba3   : > { %v2877_v27 = vpop.f32.mrf.mxu0 }
 0xba4   : > { %3977 = vmatpush3.msra.mxu1 %v2877_v27 }
 0xba5   : > { %v3975_v29 = vpop.f32.mrf.mxu0  ;;  %3979 = vmatmul.mubr.msk.f32.vlgmr.msra.gmra.mxu1 %vm1046_vm5, %v2806_v28  ;;  %3992 = vmatprep.subr.mxu1 %v3128_v5 }
 0xba6   : > { %3993 = vmatpush3.msra.mxu1 %v3128_v5 }
 0xba7   : > { %3994 = vmatprep.subr.mxu1 %v3127_v6 }
 0xba8   : > { %3995 = vmatpush3.msra.mxu1 %v3127_v6 }
 0xba9   : > { %3996 = vmatprep.subr.mxu1 %v3126_v7 }
 0xbaa   : > { %3997 = vmatpush3.msra.mxu1 %v3126_v7 }
 0xbab   : > { %3998 = vmatprep.subr.mxu1 %v3125_v8 }
 0xbac   : > { %3999 = vmatpush3.msra.mxu1 %v3125_v8 }
 0xbad   : > { %4000 = vmatprep.subr.mxu1 %v3124_v9 }
 0xbae   : > { %4001 = vmatpush3.msra.mxu1 %v3124_v9 }
 0xbaf   : > { %4002 = vmatprep.subr.mxu1 %v3123_v10 }
 0xbb0   : > { %4003 = vmatpush3.msra.mxu1 %v3123_v10 }
 0xbb1   : > { %4004 = vmatprep.subr.mxu1 %v3122_v11 }
 0xbb2   : > { %4005 = vmatpush3.msra.mxu1 %v3122_v11 }
 0xbb3   : > { %4006 = vmatprep.subr.mxu1 %v3121_v12 }
 0xbb4   : > { %4007 = vmatpush3.msra.mxu1 %v3121_v12 }
 0xc65   : > { %v2950_v31 = vpop.f32.mrf.mxu1 }
 0xc66   : > { %v2954_v32 = vadd.f32 %v2950_v31, %v2715_v25 }
 0xc67   : > { %v3980_v37 = vpop.f32.mrf.mxu1 }
 0xc68   : > { %v2963_v35 = vadd.f32 %v3744_v14, %v2954_v32  ;;  %v3750_v32 = vld [vmem:[%s874_s1] ss:$0 sm:$0xff] }
 0xc6a   : > { %v2965_v39 = vadd.f32 %v2963_v35, %v4590_v36 }
 0xc6c   : > { %v2971_v40 = vsel %vm952_vm3, %v2965_v39, 0.0 }
 0xc6d   : > { %2972 = vadd.xlane.f32.xlu1 %v2971_v40 }
 0xc71   : > { %2982 = vadd.xlane.f32.xlu1 %v2981_v44 }
 0xcf6   : > { %v2973_v45 = vpop.xlane.xlu1 %2972 }
 0xcf7   : > { %v2976_v43 = vmul.f32 0.03125, %v2973_v45 }
 0xcf9   : > { %v2978_v47 = vsub.f32 %v2965_v39, %v2976_v43 }
 0xcfa   : > { %v2983_v48 = vpop.xlane.xlu1 %2982 }
 0xcfb   : > { %v2987_v49 = vmul.f32 0.03125, %v2983_v48  ;;  %v2980_v50 = vmul.f32 %v2978_v47, %v2978_v47 }
 0xcfd   : > { %v2989_v51 = vadd.f32 1e-12, %v2987_v49  ;;  %v2984_v36 = vsel %vm952_vm3, %v2980_v50, 0.0 }
 0xcfe   : > { %2985 = vadd.xlane.f32.xlu1 %v2984_v36 }
 0xcff   : > { %4142 = vrsqrt.f32 %v2989_v51 }
 0xd0c   : > { %v4143_v52 = vpop.eup %4142 }
 0xd0d   : > { %v2993_v19 = vmul.f32 %v4143_v52, %v2977_v34 }
 0xd0f   : > { %v3001_v55 = vmul.f32 %v3745_v53, %v2993_v19 }
 0xd11   : > { %v4831_v56 = vadd.f32 %v3746_v54, %v3001_v55 }
 0xd13   : > { %3989 = vmatprep.mubr.msk.f32.mxu0 %vm952_vm3, %v4831_v56 }
 0xd87   : > { %v2986_v62 = vpop.xlane.xlu1 %2985 }
 0xd88   : > { %v2988_v63 = vmul.f32 0.03125, %v2986_v62  ;;  %v3753_v62 = vld [vmem:[%s877_s6] ss:$0 sm:$0xff]  ;;  %s5002_s6 = sld [smem:[#allocation24_spill]] (!%p3755_p10) }
 0xd8a   : > { %v2990_v0 = vadd.f32 1e-12, %v2988_v63 }
 0xd8c   : > { %4144 = vrsqrt.f32 %v2990_v0  ;;  %v3754_v0 = vld [vmem:[%s880_s18] ss:$0 sm:$0xff] }
 0xd99   : > { %v4145_v1 = vpop.eup %4144 }
 0xd9a   : > { %v2994_v2 = vmul.f32 %v4145_v1, %v2978_v47 }
 0xd9c   : > { %v3002_v3 = vmul.f32 %v3745_v53, %v2994_v2 }
 0xd9e   : > { %v3010_v4 = vadd.f32 %v3746_v54, %v3002_v3 }
 0xda0   : > { %3990 = vmatmul.mubr.msk.f32.vlgmr.msra.gmra.mxu0 %vm952_vm3, %v3010_v4 }
 0xe60   : > { %v3991_v13 = vpop.f32.mrf.mxu0 }
 0xe61   : > { %v3100_v14 = vadd.f32 %v3991_v13, %v3747_v38 }
 0xe62   : > { %v3094_v15 = vpop.f32.mrf.mxu0 }
 0xe63   : > { %v3104_v46 = vmul.f32 %v3100_v14, %v3100_v14  ;;  %v3095_v16 = vadd.f32 %v3747_v38, %v3094_v15 }
 0xe65   : > { %v3106_v17 = vmul.f32 %v3104_v46, %v3100_v14  ;;  %v3103_v18 = vmul.f32 %v3095_v16, %v3095_v16 }
 0xe67   : > { %v3108_v41 = vmul.f32 0.044715, %v3106_v17  ;;  %v3105_v20 = vmul.f32 %v3103_v18, %v3095_v16 }
 0xe69   : > { %v3110_v21 = vadd.f32 %v3108_v41, %v3100_v14  ;;  %v3107_v22 = vmul.f32 0.044715, %v3105_v20 }
 0xe6b   : > { %v3112_v23 = vmul.f32 0.7978846, %v3110_v21  ;;  %v3109_v33 = vadd.f32 %v3107_v22, %v3095_v16 }
 0xe6d   : > { %4146 = vtanh.f32 %v3112_v23  ;;  %v3111_v24 = vmul.f32 0.7978846, %v3109_v33 }
 0xe6f   : > { %4148 = vtanh.f32 %v3111_v24 }
 0xe7a   : > { %v4147_v25 = vpop.eup %4146 }
 0xe7b   : > { %v3116_v26 = vadd.f32 1.0, %v4147_v25 }
 0xe7c   : > { %v4149_v27 = vpop.eup %4148 }
 0xe7d   : > { %v3115_v28 = vadd.f32 1.0, %v4149_v27  ;;  %v3118_v29 = vmul.f32 0.5, %v3116_v26 }
 0xe7f   : > { %v3117_v30 = vmul.f32 0.5, %v3115_v28  ;;  %v3120_v31 = vmul.f32 %v3118_v29, %v3100_v14 }
 0xe81   : > { %v3119_v61 = vmul.f32 %v3117_v30, %v3095_v16 }
 0xe83   : > { %4008 = vmatprep.mubr.msk.f32.mxu1 %vm3136_vm6, %v3119_v61 }
 0xe84   : > { %4009 = vmatmul.mubr.msk.f32.vlgmr.msra.gmra.mxu1 %vm3136_vm6, %v3120_v31 }
 0xf44   : > { %v4010_v37 = vpop.f32.mrf.mxu1 }
 0xf45   : > { %v3215_v34 = vadd.f32 %v4010_v37, %v3750_v32 }
 0xf46   : > { %v3209_v35 = vpop.f32.mrf.mxu1 }
 0xf47   : > { %v3210_v39 = vadd.f32 %v3750_v32, %v3209_v35  ;;  %v3219_v40 = vadd.f32 %v3215_v34, %v3010_v4 }
 0xf49   : > { %v3225_v42 = vsel %vm952_vm3, %v3219_v40, 0.0  ;;  %v3218_v44 = vadd.f32 %v3210_v39, %v4831_v56 }
 0xf4a   : > { %3226 = vadd.xlane.f32.xlu1 %v3225_v42 }
 0xf4b   : > { %v3222_v45 = vsel %vm952_vm3, %v3218_v44, 0.0 }
 0xf4c   : > { %3223 = vadd.xlane.f32.xlu0 %v3222_v45 }
 0xfd3   : > { %v3227_v43 = vpop.xlane.xlu1 %3226 }
 0xfd4   : > { %v3229_v47 = vmul.f32 0.03125, %v3227_v43 }
 0xfd5   : > { %v3224_v48 = vpop.xlane.xlu0 %3223 }
 0xfd6   : > { %v3228_v49 = vmul.f32 0.03125, %v3224_v48  ;;  %v3231_v50 = vsub.f32 %v3219_v40, %v3229_v47 }
 0xfd8   : > { %v3230_v51 = vsub.f32 %v3218_v44, %v3228_v49  ;;  %v3233_v53 = vmul.f32 %v3231_v50, %v3231_v50 }
 0xfda   : > { %v3232_v36 = vmul.f32 %v3230_v51, %v3230_v51  ;;  %v3237_v19 = vsel %vm952_vm3, %v3233_v53, 0.0 }
 0xfdc   : > { %v3234_v52 = vsel %vm952_vm3, %v3232_v36, 0.0 }
 0xfdd   : > { %3235 = vadd.xlane.f32.xlu1 %v3234_v52 }
 0xfe1   : > { %3238 = vadd.xlane.f32.xlu1 %v3237_v19 }
0x1066   : > { %v3236_v54 = vpop.xlane.xlu1 %3235 }
0x1067   : > { %v3240_v55 = vmul.f32 0.03125, %v3236_v54 }
0x1069   : > { %v3242_v56 = vadd.f32 1e-12, %v3240_v55 }
0x106a   : > { %v3239_v57 = vpop.xlane.xlu1 %3238 }
0x106b   : > { %4150 = vrsqrt.f32 %v3242_v56  ;;  %v3241_v58 = vmul.f32 0.03125, %v3239_v57 }
0x106d   : > { %v3243_v59 = vadd.f32 1e-12, %v3241_v58 }
0x106f   : > { %4152 = vrsqrt.f32 %v3243_v59 }
0x1078   : > { %v4151_v60 = vpop.eup %4150 }
0x1079   : > { %v3246_v63 = vmul.f32 %v4151_v60, %v3230_v51 }
0x107b   : > { %v3254_v1 = vmul.f32 %v3753_v62, %v3246_v63 }
0x107c   : > { %v4153_v2 = vpop.eup %4152 }
0x107d   : > { %v3262_v3 = vadd.f32 %v3754_v0, %v3254_v1  ;;  %v3247_v4 = vmul.f32 %v4153_v2, %v3231_v50 }
0x107f   : > { %3264 = vst.msk [vmem:[#allocation2] sm:$0xff] %vm952_vm3, %v3262_v3  ;;  %v3255_v5 = vmul.f32 %v3753_v62, %v3247_v4  ;;  %3269 = sbr.rel (%p3755_p10) target bundleno = 4887 (0x1317), region = 124 }
0x1081   : > { %v3263_v6 = vadd.f32 %v3754_v0, %v3255_v5 }
0x1083   : > { %3265 = vst.msk [vmem:[#allocation2 + $0x8] sm:$0xff] %vm952_vm3, %v3263_v6 }
0x1084   : > { %v3278_v7 = vld [vmem:[%s4955_s16 + $0x18] sm:$0xff]  ;;  %v4329_v8 = vmov 0.0   ;;  %v3277_v9 = vld [vmem:[%s4955_s16 + $0x10] sm:$0xff]  ;;  %vm4330_vm7 = vmmov 0   ;;  %v3271_v10 = vrot.slane %v3263_v6, 7  ;;  %v3276_v11 = vld [vmem:[%s4955_s16 + $0x8] sm:$0xff] }
0x1085   : > { %4011 = vmatprep.subr.mxu0 %v4329_v8  ;;  %4019 = vmatprep.mubr.msk.f32.mxu0 %vm4330_vm7, %v4329_v8  ;;  %vm3273_vm8 = vcmask 1040384   ;;  %v3275_v12 = vld [vmem:[%s4955_s16] sm:$0xff]  ;;  %v3363_v13 = vld [vmem:[%s5001_s24 + $0x18] sm:$0xff]  ;;  %v3362_v14 = vld [vmem:[%s5001_s24 + $0x10] sm:$0xff]  ;;  %vm3444_vm9 = vcmask 25600   ;;  %vm3477_vm11 = vcmask 0  }
0x1086   : > { %4012 = vmatpush3.msra.mxu0 %v3278_v7  ;;  %4022 = vmatprep.subr.mxu1 %v4329_v8  ;;  %v3274_v38 = vsel %vm3273_vm8, %v3262_v3, %v3271_v10  ;;  %v3361_v15 = vld [vmem:[%s5001_s24 + $0x8] sm:$0xff]  ;;  %v3360_v46 = vld [vmem:[%s5001_s24] sm:$0xff] }
0x1087   : > { %4013 = vmatprep.subr.mxu0 %v4329_v8  ;;  %4030 = vmatprep.mubr.msk.f32.mxu1 %vm4330_vm7, %v4329_v8  ;;  %v3756_v16 = vld [vmem:[%s5002_s6] ss:$0 sm:$0xff] }
0x1088   : > { %4014 = vmatpush3.msra.mxu0 %v3277_v9  ;;  %4023 = vmatpush3.msra.mxu1 %v3363_v13  ;;  %v3758_v21 = vld [vmem:[%s5003_s23] ss:$0 sm:$0xff] }
0x1089   : > { %4015 = vmatprep.subr.mxu0 %v4329_v8  ;;  %4024 = vmatprep.subr.mxu1 %v4329_v8  ;;  %v3446_v30 = vld [vmem:[%s5004_s5] sm:$0x3] }
0x108a   : > { %4016 = vmatpush3.msra.mxu0 %v3276_v11  ;;  %4025 = vmatpush3.msra.mxu1 %v3362_v14 }
0x108b   : > { %4017 = vmatprep.subr.mxu0 %v4329_v8  ;;  %4026 = vmatprep.subr.mxu1 %v4329_v8 }
0x108c   : > { %4018 = vmatpush3.msra.mxu0 %v3275_v12  ;;  %4027 = vmatpush3.msra.mxu1 %v3361_v15 }
0x108d   : > { %4020 = vmatmul.mubr.msk.f32.vlgmr.msra.gmra.mxu0 %vm952_vm3, %v3274_v38  ;;  %4028 = vmatprep.subr.mxu1 %v4329_v8 }
0x108e   : > { %4029 = vmatpush3.msra.mxu1 %v3360_v46 }
0x114d   : > { %v3355_v17 = vpop.f32.mrf.mxu0 }
0x114e   : > { %v3356_v18 = vadd.f32 %v3756_v16, %v3355_v17 }
0x114f   : > { %v4021_v41 = vpop.f32.mrf.mxu0 }
0x1150   : > { %4154 = vtanh.f32 %v3356_v18 }
0x115d   : > { %v4155_v20 = vpop.eup %4154 }
0x115e   : > { %4031 = vmatmul.mubr.msk.f32.vlgmr.msra.gmra.mxu1 %vm952_vm3, %v4155_v20 }
0x121e   : > { %v3440_v22 = vpop.f32.mrf.mxu1 }
0x121f   : > { %v3441_v23 = vadd.f32 %v3758_v21, %v3440_v22 }
0x1220   : > { %v4032_v33 = vpop.f32.mrf.mxu1 }
0x1221   : > { %v3450_v24 = vand.u32 2147483647, %v3441_v23  ;;  %3445 = vst.msk [vmem:[#allocation9] sm:$0x3] %vm3444_vm9, %v3441_v23  ;;  %v3447_v31 = vmax.f32 %v3441_v23, 0.0  ;;  %v3448_v32 = vmul.f32 %v3446_v30, %v3441_v23 }
0x1223   : > { %v3451_v25 = vsub.f32 0.0, %v3450_v24  ;;  %v3449_v40 = vsub.f32 %v3447_v31, %v3448_v32 }
0x1225   : > { %v3452_v26 = vmul.f32 1.442695, %v3451_v25 }
0x1227   : > { %4156 = vpow2.f32 %v3452_v26 }
0x1234   : > { %v4157_v27 = vpop.eup %4156 }
0x1235   : > { %v3454_v28 = vadd.f32 1.0, %v4157_v27  ;;  %v3457_v29 = vmul.f32 -0.5, %v4157_v27  ;;  %v3460_v37 = vand.u32 2147483647, %v4157_v27 }
0x1237   : > { %4158 = vlog2.f32 %v3454_v28  ;;  %v3458_v61 = vadd.f32 1.0, %v3457_v29  ;;  %vm3461_vm10 = vcmp.lt.f32.partialorder %v3460_v37, 0.0004427343 }
0x1239   : > { %v3459_v39 = vmul.f32 %v4157_v27, %v3458_v61 }
0x1244   : > { %v4159_v34 = vpop.eup %4158 }
0x1245   : > { %v3456_v35 = vmul.f32 0.6931472, %v4159_v34 }
0x1247   : > { %v3462_v42 = vsel %vm3461_vm10, %v3459_v39, %v3456_v35 }
0x1248   : > { %v3463_v44 = vadd.f32 %v3462_v42, %v3449_v40 }
0x124a   : > { %v3464_v45 = vsel %vm3444_vm9, %v3463_v44, 0.0 }
0x124b   : > { %3465 = vadd.xlane.f32.xlu0 %v3464_v45 }
0x12d4   : > { %v3466_v43 = vpop.xlane.xlu0 %3465 }
0x12d5   : > { %v3467_v47 = vrot.slane %v3466_v43, 4 }
0x12d7   : > { %v3468_v48 = vadd.f32 %v3467_v47, %v3466_v43 }
0x12d9   : > { %v3469_v49 = vrot.slane %v3468_v48, 2 }
0x12db   : > { %v3470_v50 = vadd.f32 %v3469_v49, %v3468_v48 }
0x12dd   : > { %v3471_v51 = vrot.slane %v3470_v50, 1 }
0x12df   : > { %v3472_v36 = vadd.f32 %v3471_v51, %v3470_v50 }
0x12e1   : > { %4033 = vpush %v3472_v36 }
0x1312   : > { %s4034_s2 = spop %4033 }
0x1313   : > { %v3474_v52 = vstv %s4034_s2 }
0x1314   : > { %v3476_v53 = vmul.f32 0.125, %v3474_v52 }
0x1316   : > { %3478 = vst.msk [vmem:[#allocation10] sm:$0x1] %vm3477_vm11, %v3476_v53 }
0x1317 PF: > { %p4071_p2 = scmp.eq.s32.totalorder %s4454_s30, 1  ;;  %s4331_s0 = smov [#allocation9]  }
0x1318   : > { %s3486_s27 = sshll.u32 %s4331_s0, 4  ;;  %s4332_s26 = smov [#allocation10]   ;;  %s3487_s27 = int_to_ptr.vmem [resolvable:$true] %s3486_s27 }
0x1319   : > { %s3497_s4 = sshll.u32 %s4332_s26, 4  ;;  %s4238_s20 = scalar_lea.vmem %s3487_s27, 32  ;;  %s3498_s4 = int_to_ptr.vmem [resolvable:$true] %s3497_s4 }
0x131a   : > { %p4239_p3 = scmp.ne.s32.totalorder %s3487_s27, %s4238_s20  ;;  %p4245_p12 = scmp.lt.s32.totalorder %s3487_s27, %s3487_s27 }
0x131b   : > { %p4246_p13 = scmp.lt.s32.totalorder %s4238_s20, %s4238_s20 }
0x131c   : > { %p4240_p4 = pnand %p4239_p3, %p4071_p2 }
0x131d   : > { %p4247_p0 = por %p4246_p13, %p4245_p12 }
0x131e   : > { %p4241_p11 = pneg %p4240_p4 }
0x1320   : > { %p4248_p7 = pnand %p4247_p0, %p4241_p11 }
0x1322   : > { %4251 = shalt.err (!%p4248_p7)
}
0x1323   : > { %s5005_s3 = sld [smem:[#allocation28_spill]]  ;;  %s4262_s28 = scalar_lea.vmem %s3498_s4, 16 }
0x1324   : > { %p4263_p1 = scmp.ne.s32.totalorder %s3498_s4, %s4262_s28  ;;  %s4268_s21 = scalar_lea.vmem %s3498_s4, 32 }
0x1325   : > { %p4269_p9 = scmp.lt.s32.totalorder %s3498_s4, %s3498_s4  ;;  %p4270_p6 = scmp.lt.s32.totalorder %s4268_s21, %s4262_s28 }
0x1326   : > { %p4264_p5 = pnand %p4263_p1, %p4071_p2 }
0x1327   : > { %p4271_p10 = por %p4270_p6, %p4269_p9 }
0x1328   : > { %p4265_p8 = pneg %p4264_p5 }
0x1329   : > { %4048 = dma.vmem_to_hbm [thread:$0]  (%p4071_p2), %s3487_s27, 32, %s5005_s3, [#allocation5]  }
0x132a   : > { %p4272_p3 = pnand %p4271_p10, %p4265_p8 }
0x132c   : > { %4275 = shalt.err (!%p4272_p3)
}
0x132d   : > { %s5006_s18 = sld [smem:[#allocation29_spill]] }
0x1333   : > { %4050 = dma.vmem_to_hbm [thread:$0]  (%p4071_p2), %s3498_s4, 16, %s5006_s18, [#allocation11]  }
0x1334   : > { %4299 = dma.done.wait (%p4071_p2), [#allocation5], 32  }
0x1335   : > { %4301 = vsyncadd (%p4071_p2), [#allocation5], 4294967264 }
0x1336   : > { %4303 = dma.done.wait (%p4071_p2), [#allocation11], 16  }
0x1337   : > { %4305 = vsyncadd (%p4071_p2), [#allocation11], 4294967280 }
0x1338 PF: > { %s5007_s23 = sld [smem:[#allocation16_spill]] }
0x133e   : > { %s37_s3 = sadd.s32 1, %s5007_s23  }
0x133f   : > { %p34_p4 = scmp.ge.s32.totalorder %s37_s3, 4  }
0x1341   :  { %36 = sbr.rel (!%p34_p4) target bundleno = 18 (0x12), region = 193 }
0x1346   :  { %3514 = vsyncpa [#allocation4], 1 }
0x1347   :  { %3516 = vsyncpa [#allocation4 + $0x1], 1 }
0x1348   :  { %3517 = vsyncpa [#allocation7], 1 }
0x1349   :  { %3518 = vsyncpa [#allocation5], 1 }
0x134a   :  { %3520 = vsyncpa [#allocation5 + $0x1], 1 }
0x134b   :  { %3521 = vsyncpa [#allocation11], 1 }

</bundles_post_ra>
